<compile_context>
chip_gen: v7x
topology: tpu7x:2x2x1
jax: 0.10.0
libtpu: 0.0.40
codegen_flags: <defaults>
</compile_context>

<pallas_src>
import functools

import numpy as np
import jax
import jax.numpy as jnp
from jax.experimental import pallas as pl
from jax.experimental.pallas import tpu as pltpu


# ------------------------------ fused kernel ------------------------------- #

def _basic_block_kernel(x_ref, rc_ref, w1_ref, b1_ref, w2_ref, b2_ref, wfc_ref,
                        o_ref, *, H, W, C):
    """Whole BasicBlock forward for one batch element, lane-dense (C, H*W).

    x_ref  : (1, C, H*W)   input image, spatial flattened onto lanes
    rc_ref : (2, H*W)      int32 (row, col) index of every flat position
    w1_ref : (C, 9*C)      conv1 weight, tap-major (kh, kw, cin), BN1 scale folded
    b1_ref : (C, 1)        folded BN1 bias
    w2_ref : (C, 9*C)      conv2 weight, BN2 scale folded
    b2_ref : (C, 1)        folded BN2 bias
    wfc_ref: (C, C)        DRS_learnable nn.Linear weight (out, in)
    o_ref  : (1, C, H*W)
    """
    HW = H * W
    rc = rc_ref[...]
    row = rc[0:1, :]                      # (1, HW) int32
    col = rc[1:2, :]                      # (1, HW) int32

    def conv3x3_bn(v, w_flat, bias):
        # v: (C, HW) f32.  out[co, p] = sum_{tap, ci} w[co, tap*C+ci] * shift(v[ci])
        acc = jnp.zeros((C, HW), jnp.float32)
        for kh in range(3):
            for kw in range(3):
                dh, dw = kh - 1, kw - 1
                s = dh * W + dw
                if s == 0:
                    xs = v
                else:
                    # xs[p] = v[(p + s) mod HW]; wrapped / out-of-image lanes
                    # are zeroed by the boundary mask (== conv zero padding).
                    shifted = pltpu.roll(v, shift=(HW - s) % HW, axis=1)
                    conds = []
                    if dh < 0:
                        conds.append(row >= -dh)
                    if dh > 0:
                        conds.append(row < H - dh)
                    if dw < 0:
                        conds.append(col >= -dw)
                    if dw > 0:
                        conds.append(col < W - dw)
                    valid = conds[0]
                    for c in conds[1:]:
                        valid = valid & c
                    xs = jnp.where(valid, shifted, 0.0)
                t = kh * 3 + kw
                for ci in range(C):
                    j = t * C + ci
                    # (C,1) weight column x (1,HW) input row -> VPU FMA.
                    acc = acc + w_flat[:, j:j + 1] * xs[ci:ci + 1, :]
        return acc + bias

    x = x_ref[0]                          # (C, HW) f32
    w1 = w1_ref[...]
    w2 = w2_ref[...]

    out = conv3x3_bn(x, w1, b1_ref[...])  # conv1 + bn1
    out = jnp.maximum(out, 0.0)           # relu
    out = conv3x3_bn(out, w2, b2_ref[...])  # conv2 + bn2
    y = jnp.maximum(out + x, 0.0)         # += identity ; relu

    # ------------------------- DRS_learnable -------------------------------
    x_max = jnp.max(y, axis=1, keepdims=True)              # (C, 1) global max
    avg = jnp.sum(y, axis=1, keepdims=True) * (1.0 / HW)   # (C, 1) global avg
    wfc = wfc_ref[...]
    control = jnp.zeros((C, 1), jnp.float32)
    for ci in range(C):                   # control = Wfc @ avg  (tiny, VPU)
        control = control + wfc[:, ci:ci + 1] * avg[ci:ci + 1, :]
    control = jax.nn.sigmoid(control)                       # (C, 1)

    o_ref[0] = jnp.minimum(y, x_max * control).astype(o_ref.dtype)


# -------------------------------- wrapper ----------------------------------- #

def _fold_bn_into_conv(w_oihw, gamma, beta, mean, var, eps):
    """Fold inference-mode BatchNorm into conv weight/bias.

    Returns (w_flat, bias):
      w_flat: (Cout, 9*Cin), tap-major (kh, kw, cin), scaled by gamma/sqrt(var+eps)
      bias  : (Cout, 1) = beta - mean * scale
    """
    cout, cin = w_oihw.shape[0], w_oihw.shape[1]
    scale = gamma / jnp.sqrt(var + eps)
    w_flat = jnp.transpose(w_oihw, (0, 2, 3, 1)).reshape(cout, 9 * cin)
    w_flat = (w_flat * scale[:, None]).astype(jnp.float32)
    bias = ((beta - mean * scale)[:, None]).astype(jnp.float32)
    return w_flat, bias


def basic_block_forward(x_nchw, w1_oihw, w2_oihw, wfc, bn1=None, bn2=None,
                        eps=1e-5):
    """BasicBlock forward (stride=1, downsample=None, delta=0 -> DRS_learnable).

    bn1 / bn2: optional (gamma, beta, running_mean, running_var) tuples;
    defaults are nn.BatchNorm2d init values, evaluated in inference mode.
    """
    N, C, H, W = x_nchw.shape
    HW = H * W

    def _default_bn():
        return (jnp.ones((C,), jnp.float32), jnp.zeros((C,), jnp.float32),
                jnp.zeros((C,), jnp.float32), jnp.ones((C,), jnp.float32))

    if bn1 is None:
        bn1 = _default_bn()
    if bn2 is None:
        bn2 = _default_bn()
    w1f, b1 = _fold_bn_into_conv(w1_oihw, *bn1, eps)
    w2f, b2 = _fold_bn_into_conv(w2_oihw, *bn2, eps)

    # Free reshape: NCHW -> (N, C, H*W) lane-dense view (no transpose, no pad).
    x2 = x_nchw.reshape(N, C, HW)
    # (row, col) of every flattened spatial position (trace-time constants).
    flat = np.arange(HW, dtype=np.int32)
    rc = jnp.asarray(np.stack([flat // W, flat % W]))        # (2, HW) int32

    kern = functools.partial(_basic_block_kernel, H=H, W=W, C=C)
    out = pl.pallas_call(
        kern,
        out_shape=jax.ShapeDtypeStruct((N, C, HW), jnp.float32),
        grid=(N,),
        in_specs=[
            pl.BlockSpec((1, C, HW), lambda n: (n, 0, 0)),   # x
            pl.BlockSpec((2, HW), lambda n: (0, 0)),         # row/col indices
            pl.BlockSpec((C, 9 * C), lambda n: (0, 0)),      # w1 (BN folded)
            pl.BlockSpec((C, 1), lambda n: (0, 0)),          # b1
            pl.BlockSpec((C, 9 * C), lambda n: (0, 0)),      # w2 (BN folded)
            pl.BlockSpec((C, 1), lambda n: (0, 0)),          # b2
            pl.BlockSpec((C, C), lambda n: (0, 0)),          # wfc
        ],
        out_specs=pl.BlockSpec((1, C, HW), lambda n: (n, 0, 0)),
        compiler_params=pltpu.CompilerParams(
            dimension_semantics=("parallel",)),              # batch across TCs
    )(x2, rc, w1f, b1, w2f, b2, wfc)
    return out.reshape(N, C, H, W)                           # free reshape back


# ------------------------------- reference ---------------------------------- #

def reference(x, w1, w2, wfc):
    eps = 1e-5

    def conv(inp, w):
        return jax.lax.conv_general_dilated(
            inp, w, (1, 1), ((1, 1), (1, 1)),
            dimension_numbers=("NCHW", "OIHW", "NCHW"))

    bn = lambda y: y / jnp.sqrt(1.0 + eps)       # default BN stats, eval mode
    out = jax.nn.relu(bn(conv(x, w1)))
    out = bn(conv(out, w2))
    out = out + x
    out = jax.nn.relu(out)
    x_max = jnp.max(out, axis=(2, 3), keepdims=True)
    avg = jnp.mean(out, axis=(2, 3))
    control = jax.nn.sigmoid(avg @ wfc.T)[:, :, None, None]
    return jnp.minimum(out, x_max * control)


# --------------------------------- main -------------------------------------- #

if __name__ == "__main__":
    key = jax.random.PRNGKey(0)
    N, C, H, W = 2, 4, 16, 16               # inplanes = planes = 4
    k1, k2, k3, k4 = jax.random.split(key, 4)

    x = jax.random.normal(k1, (N, C, H, W), jnp.float32)
    # conv weights (OIHW, PyTorch convention), kaiming-ish scale
    n_fan = 3 * 3 * C
    w1 = jax.random.normal(k2, (C, C, 3, 3), jnp.float32) * (2.0 / n_fan) ** 0.5
    w2 = jax.random.normal(k3, (C, C, 3, 3), jnp.float32) * (2.0 / n_fan) ** 0.5
    # DRS_learnable fc weight: normal(0, 0.01), no bias
    wfc = jax.random.normal(k4, (C, C), jnp.float32) * 0.01

    out = jax.block_until_ready(basic_block_forward(x, w1, w2, wfc))

    ref = reference(x, w1, w2, wfc)
    assert out.shape == (N, C, H, W)
    max_err = float(jnp.max(jnp.abs(out - ref)))
    assert jnp.allclose(out, ref, atol=1e-4, rtol=1e-4), max_err
    print("KERNEL_OK")
</pallas_src>

<mosaic_0001>
module attributes {stable_mosaic.version = 11 : i64} {
  func.func @_basic_block_kernel(%arg0: i32, %arg1: memref<1x4x256xf32, #tpu.memory_space<vmem>>, %arg2: memref<2x256xi32, #tpu.memory_space<vmem>>, %arg3: memref<4x36xf32, #tpu.memory_space<vmem>>, %arg4: memref<4x1xf32, #tpu.memory_space<vmem>>, %arg5: memref<4x36xf32, #tpu.memory_space<vmem>>, %arg6: memref<4x1xf32, #tpu.memory_space<vmem>>, %arg7: memref<4x4xf32, #tpu.memory_space<vmem>>, %arg8: memref<1x4x256xf32, #tpu.memory_space<vmem>>) attributes {dimension_semantics = [#tpu.dimension_semantics<parallel>], iteration_bounds = array<i64: 2>, scalar_prefetch = 0 : i64, scratch_operands = 0 : i64, tpu.core_type = #tpu.core_type<tc>, window_params = [{transform_indices = @transform_0, window_bounds = array<i64: 1, 4, 256>}, {pipeline_mode = #tpu.pipeline_mode<synchronous>, transform_indices = @transform_1, window_bounds = array<i64: 2, 256>}, {pipeline_mode = #tpu.pipeline_mode<synchronous>, transform_indices = @transform_2, window_bounds = array<i64: 4, 36>}, {pipeline_mode = #tpu.pipeline_mode<synchronous>, transform_indices = @transform_3, window_bounds = array<i64: 4, 1>}, {pipeline_mode = #tpu.pipeline_mode<synchronous>, transform_indices = @transform_4, window_bounds = array<i64: 4, 36>}, {pipeline_mode = #tpu.pipeline_mode<synchronous>, transform_indices = @transform_5, window_bounds = array<i64: 4, 1>}, {pipeline_mode = #tpu.pipeline_mode<synchronous>, transform_indices = @transform_6, window_bounds = array<i64: 4, 4>}, {transform_indices = @transform_7, window_bounds = array<i64: 1, 4, 256>}]} {
    %c0 = arith.constant 0 : index
    %c0_0 = arith.constant 0 : index
    %0 = vector.load %arg2[%c0, %c0_0] : memref<2x256xi32, #tpu.memory_space<vmem>>, vector<2x256xi32>
    %1 = vector.extract_strided_slice %0 {offsets = [0, 0], sizes = [1, 256], strides = [1, 1]} : vector<2x256xi32> to vector<1x256xi32>
    %2 = vector.extract_strided_slice %0 {offsets = [1, 0], sizes = [1, 256], strides = [1, 1]} : vector<2x256xi32> to vector<1x256xi32>
    %c0_1 = arith.constant 0 : index
    %c0_2 = arith.constant 0 : index
    %c0_3 = arith.constant 0 : index
    %3 = vector.load %arg1[%c0_1, %c0_2, %c0_3] : memref<1x4x256xf32, #tpu.memory_space<vmem>>, vector<1x4x256xf32>
    %4 = vector.shape_cast %3 : vector<1x4x256xf32> to vector<4x256xf32>
    %c0_4 = arith.constant 0 : index
    %c0_5 = arith.constant 0 : index
    %5 = vector.load %arg3[%c0_4, %c0_5] : memref<4x36xf32, #tpu.memory_space<vmem>>, vector<4x36xf32>
    %c0_6 = arith.constant 0 : index
    %c0_7 = arith.constant 0 : index
    %6 = vector.load %arg5[%c0_6, %c0_7] : memref<4x36xf32, #tpu.memory_space<vmem>>, vector<4x36xf32>
    %c0_8 = arith.constant 0 : index
    %c0_9 = arith.constant 0 : index
    %7 = vector.load %arg4[%c0_8, %c0_9] : memref<4x1xf32, #tpu.memory_space<vmem>>, vector<4x1xf32>
    %cst = arith.constant 0.000000e+00 : f32
    %8 = vector.broadcast %cst : f32 to vector<4x256xf32>
    %c17_i32 = arith.constant 17 : i32
    %9 = tpu.dynamic_rotate %4 by %c17_i32 dim 1 : vector<4x256xf32>, i32 -> vector<4x256xf32>
    %c1_i32 = arith.constant 1 : i32
    %10 = vector.broadcast %c1_i32 : i32 to vector<1x256xi32>
    %11 = arith.cmpi sge, %1, %10 : vector<1x256xi32>
    %c1_i32_10 = arith.constant 1 : i32
    %12 = vector.broadcast %c1_i32_10 : i32 to vector<1x256xi32>
    %13 = arith.cmpi sge, %2, %12 : vector<1x256xi32>
    %14 = arith.andi %11, %13 : vector<1x256xi1>
    %cst_11 = arith.constant 0.000000e+00 : f32
    %15 = vector.shape_cast %14 : vector<1x256xi1> to vector<1x256xi1>
    %16 = vector.broadcast %15 : vector<1x256xi1> to vector<4x256xi1>
    %17 = vector.broadcast %cst_11 : f32 to vector<4x256xf32>
    %18 = arith.select %16, %9, %17 : vector<4x256xi1>, vector<4x256xf32>
    %19 = vector.extract_strided_slice %5 {offsets = [0, 0], sizes = [4, 1], strides = [1, 1]} : vector<4x36xf32> to vector<4x1xf32>
    %20 = vector.extract_strided_slice %18 {offsets = [0, 0], sizes = [1, 256], strides = [1, 1]} : vector<4x256xf32> to vector<1x256xf32>
    %21 = vector.broadcast %19 : vector<4x1xf32> to vector<4x256xf32>
    %22 = vector.broadcast %20 : vector<1x256xf32> to vector<4x256xf32>
    %23 = arith.mulf %21, %22 : vector<4x256xf32>
    %24 = arith.addf %8, %23 : vector<4x256xf32>
    %25 = vector.extract_strided_slice %5 {offsets = [0, 1], sizes = [4, 1], strides = [1, 1]} : vector<4x36xf32> to vector<4x1xf32>
    %26 = vector.extract_strided_slice %18 {offsets = [1, 0], sizes = [1, 256], strides = [1, 1]} : vector<4x256xf32> to vector<1x256xf32>
    %27 = vector.broadcast %25 : vector<4x1xf32> to vector<4x256xf32>
    %28 = vector.broadcast %26 : vector<1x256xf32> to vector<4x256xf32>
    %29 = arith.mulf %27, %28 : vector<4x256xf32>
    %30 = arith.addf %24, %29 : vector<4x256xf32>
    %31 = vector.extract_strided_slice %5 {offsets = [0, 2], sizes = [4, 1], strides = [1, 1]} : vector<4x36xf32> to vector<4x1xf32>
    %32 = vector.extract_strided_slice %18 {offsets = [2, 0], sizes = [1, 256], strides = [1, 1]} : vector<4x256xf32> to vector<1x256xf32>
    %33 = vector.broadcast %31 : vector<4x1xf32> to vector<4x256xf32>
    %34 = vector.broadcast %32 : vector<1x256xf32> to vector<4x256xf32>
    %35 = arith.mulf %33, %34 : vector<4x256xf32>
    %36 = arith.addf %30, %35 : vector<4x256xf32>
    %37 = vector.extract_strided_slice %5 {offsets = [0, 3], sizes = [4, 1], strides = [1, 1]} : vector<4x36xf32> to vector<4x1xf32>
    %38 = vector.extract_strided_slice %18 {offsets = [3, 0], sizes = [1, 256], strides = [1, 1]} : vector<4x256xf32> to vector<1x256xf32>
    %39 = vector.broadcast %37 : vector<4x1xf32> to vector<4x256xf32>
    %40 = vector.broadcast %38 : vector<1x256xf32> to vector<4x256xf32>
    %41 = arith.mulf %39, %40 : vector<4x256xf32>
    %42 = arith.addf %36, %41 : vector<4x256xf32>
    %c16_i32 = arith.constant 16 : i32
    %43 = tpu.dynamic_rotate %4 by %c16_i32 dim 1 : vector<4x256xf32>, i32 -> vector<4x256xf32>
    %c1_i32_12 = arith.constant 1 : i32
    %44 = vector.broadcast %c1_i32_12 : i32 to vector<1x256xi32>
    %45 = arith.cmpi sge, %1, %44 : vector<1x256xi32>
    %cst_13 = arith.constant 0.000000e+00 : f32
    %46 = vector.shape_cast %45 : vector<1x256xi1> to vector<1x256xi1>
    %47 = vector.broadcast %46 : vector<1x256xi1> to vector<4x256xi1>
    %48 = vector.broadcast %cst_13 : f32 to vector<4x256xf32>
    %49 = arith.select %47, %43, %48 : vector<4x256xi1>, vector<4x256xf32>
    %50 = vector.extract_strided_slice %5 {offsets = [0, 4], sizes = [4, 1], strides = [1, 1]} : vector<4x36xf32> to vector<4x1xf32>
    %51 = vector.extract_strided_slice %49 {offsets = [0, 0], sizes = [1, 256], strides = [1, 1]} : vector<4x256xf32> to vector<1x256xf32>
    %52 = vector.broadcast %50 : vector<4x1xf32> to vector<4x256xf32>
    %53 = vector.broadcast %51 : vector<1x256xf32> to vector<4x256xf32>
    %54 = arith.mulf %52, %53 : vector<4x256xf32>
    %55 = arith.addf %42, %54 : vector<4x256xf32>
    %56 = vector.extract_strided_slice %5 {offsets = [0, 5], sizes = [4, 1], strides = [1, 1]} : vector<4x36xf32> to vector<4x1xf32>
    %57 = vector.extract_strided_slice %49 {offsets = [1, 0], sizes = [1, 256], strides = [1, 1]} : vector<4x256xf32> to vector<1x256xf32>
    %58 = vector.broadcast %56 : vector<4x1xf32> to vector<4x256xf32>
    %59 = vector.broadcast %57 : vector<1x256xf32> to vector<4x256xf32>
    %60 = arith.mulf %58, %59 : vector<4x256xf32>
    %61 = arith.addf %55, %60 : vector<4x256xf32>
    %62 = vector.extract_strided_slice %5 {offsets = [0, 6], sizes = [4, 1], strides = [1, 1]} : vector<4x36xf32> to vector<4x1xf32>
    %63 = vector.extract_strided_slice %49 {offsets = [2, 0], sizes = [1, 256], strides = [1, 1]} : vector<4x256xf32> to vector<1x256xf32>
    %64 = vector.broadcast %62 : vector<4x1xf32> to vector<4x256xf32>
    %65 = vector.broadcast %63 : vector<1x256xf32> to vector<4x256xf32>
    %66 = arith.mulf %64, %65 : vector<4x256xf32>
    %67 = arith.addf %61, %66 : vector<4x256xf32>
    %68 = vector.extract_strided_slice %5 {offsets = [0, 7], sizes = [4, 1], strides = [1, 1]} : vector<4x36xf32> to vector<4x1xf32>
    %69 = vector.extract_strided_slice %49 {offsets = [3, 0], sizes = [1, 256], strides = [1, 1]} : vector<4x256xf32> to vector<1x256xf32>
    %70 = vector.broadcast %68 : vector<4x1xf32> to vector<4x256xf32>
    %71 = vector.broadcast %69 : vector<1x256xf32> to vector<4x256xf32>
    %72 = arith.mulf %70, %71 : vector<4x256xf32>
    %73 = arith.addf %67, %72 : vector<4x256xf32>
    %c15_i32 = arith.constant 15 : i32
    %74 = tpu.dynamic_rotate %4 by %c15_i32 dim 1 : vector<4x256xf32>, i32 -> vector<4x256xf32>
    %c1_i32_14 = arith.constant 1 : i32
    %75 = vector.broadcast %c1_i32_14 : i32 to vector<1x256xi32>
    %76 = arith.cmpi sge, %1, %75 : vector<1x256xi32>
    %c15_i32_15 = arith.constant 15 : i32
    %77 = vector.broadcast %c15_i32_15 : i32 to vector<1x256xi32>
    %78 = arith.cmpi slt, %2, %77 : vector<1x256xi32>
    %79 = arith.andi %76, %78 : vector<1x256xi1>
    %cst_16 = arith.constant 0.000000e+00 : f32
    %80 = vector.shape_cast %79 : vector<1x256xi1> to vector<1x256xi1>
    %81 = vector.broadcast %80 : vector<1x256xi1> to vector<4x256xi1>
    %82 = vector.broadcast %cst_16 : f32 to vector<4x256xf32>
    %83 = arith.select %81, %74, %82 : vector<4x256xi1>, vector<4x256xf32>
    %84 = vector.extract_strided_slice %5 {offsets = [0, 8], sizes = [4, 1], strides = [1, 1]} : vector<4x36xf32> to vector<4x1xf32>
    %85 = vector.extract_strided_slice %83 {offsets = [0, 0], sizes = [1, 256], strides = [1, 1]} : vector<4x256xf32> to vector<1x256xf32>
    %86 = vector.broadcast %84 : vector<4x1xf32> to vector<4x256xf32>
    %87 = vector.broadcast %85 : vector<1x256xf32> to vector<4x256xf32>
    %88 = arith.mulf %86, %87 : vector<4x256xf32>
    %89 = arith.addf %73, %88 : vector<4x256xf32>
    %90 = vector.extract_strided_slice %5 {offsets = [0, 9], sizes = [4, 1], strides = [1, 1]} : vector<4x36xf32> to vector<4x1xf32>
    %91 = vector.extract_strided_slice %83 {offsets = [1, 0], sizes = [1, 256], strides = [1, 1]} : vector<4x256xf32> to vector<1x256xf32>
    %92 = vector.broadcast %90 : vector<4x1xf32> to vector<4x256xf32>
    %93 = vector.broadcast %91 : vector<1x256xf32> to vector<4x256xf32>
    %94 = arith.mulf %92, %93 : vector<4x256xf32>
    %95 = arith.addf %89, %94 : vector<4x256xf32>
    %96 = vector.extract_strided_slice %5 {offsets = [0, 10], sizes = [4, 1], strides = [1, 1]} : vector<4x36xf32> to vector<4x1xf32>
    %97 = vector.extract_strided_slice %83 {offsets = [2, 0], sizes = [1, 256], strides = [1, 1]} : vector<4x256xf32> to vector<1x256xf32>
    %98 = vector.broadcast %96 : vector<4x1xf32> to vector<4x256xf32>
    %99 = vector.broadcast %97 : vector<1x256xf32> to vector<4x256xf32>
    %100 = arith.mulf %98, %99 : vector<4x256xf32>
    %101 = arith.addf %95, %100 : vector<4x256xf32>
    %102 = vector.extract_strided_slice %5 {offsets = [0, 11], sizes = [4, 1], strides = [1, 1]} : vector<4x36xf32> to vector<4x1xf32>
    %103 = vector.extract_strided_slice %83 {offsets = [3, 0], sizes = [1, 256], strides = [1, 1]} : vector<4x256xf32> to vector<1x256xf32>
    %104 = vector.broadcast %102 : vector<4x1xf32> to vector<4x256xf32>
    %105 = vector.broadcast %103 : vector<1x256xf32> to vector<4x256xf32>
    %106 = arith.mulf %104, %105 : vector<4x256xf32>
    %107 = arith.addf %101, %106 : vector<4x256xf32>
    %c1_i32_17 = arith.constant 1 : i32
    %108 = tpu.dynamic_rotate %4 by %c1_i32_17 dim 1 : vector<4x256xf32>, i32 -> vector<4x256xf32>
    %c1_i32_18 = arith.constant 1 : i32
    %109 = vector.broadcast %c1_i32_18 : i32 to vector<1x256xi32>
    %110 = arith.cmpi sge, %2, %109 : vector<1x256xi32>
    %cst_19 = arith.constant 0.000000e+00 : f32
    %111 = vector.shape_cast %110 : vector<1x256xi1> to vector<1x256xi1>
    %112 = vector.broadcast %111 : vector<1x256xi1> to vector<4x256xi1>
    %113 = vector.broadcast %cst_19 : f32 to vector<4x256xf32>
    %114 = arith.select %112, %108, %113 : vector<4x256xi1>, vector<4x256xf32>
    %115 = vector.extract_strided_slice %5 {offsets = [0, 12], sizes = [4, 1], strides = [1, 1]} : vector<4x36xf32> to vector<4x1xf32>
    %116 = vector.extract_strided_slice %114 {offsets = [0, 0], sizes = [1, 256], strides = [1, 1]} : vector<4x256xf32> to vector<1x256xf32>
    %117 = vector.broadcast %115 : vector<4x1xf32> to vector<4x256xf32>
    %118 = vector.broadcast %116 : vector<1x256xf32> to vector<4x256xf32>
    %119 = arith.mulf %117, %118 : vector<4x256xf32>
    %120 = arith.addf %107, %119 : vector<4x256xf32>
    %121 = vector.extract_strided_slice %5 {offsets = [0, 13], sizes = [4, 1], strides = [1, 1]} : vector<4x36xf32> to vector<4x1xf32>
    %122 = vector.extract_strided_slice %114 {offsets = [1, 0], sizes = [1, 256], strides = [1, 1]} : vector<4x256xf32> to vector<1x256xf32>
    %123 = vector.broadcast %121 : vector<4x1xf32> to vector<4x256xf32>
    %124 = vector.broadcast %122 : vector<1x256xf32> to vector<4x256xf32>
    %125 = arith.mulf %123, %124 : vector<4x256xf32>
    %126 = arith.addf %120, %125 : vector<4x256xf32>
    %127 = vector.extract_strided_slice %5 {offsets = [0, 14], sizes = [4, 1], strides = [1, 1]} : vector<4x36xf32> to vector<4x1xf32>
    %128 = vector.extract_strided_slice %114 {offsets = [2, 0], sizes = [1, 256], strides = [1, 1]} : vector<4x256xf32> to vector<1x256xf32>
    %129 = vector.broadcast %127 : vector<4x1xf32> to vector<4x256xf32>
    %130 = vector.broadcast %128 : vector<1x256xf32> to vector<4x256xf32>
    %131 = arith.mulf %129, %130 : vector<4x256xf32>
    %132 = arith.addf %126, %131 : vector<4x256xf32>
    %133 = vector.extract_strided_slice %5 {offsets = [0, 15], sizes = [4, 1], strides = [1, 1]} : vector<4x36xf32> to vector<4x1xf32>
    %134 = vector.extract_strided_slice %114 {offsets = [3, 0], sizes = [1, 256], strides = [1, 1]} : vector<4x256xf32> to vector<1x256xf32>
    %135 = vector.broadcast %133 : vector<4x1xf32> to vector<4x256xf32>
    %136 = vector.broadcast %134 : vector<1x256xf32> to vector<4x256xf32>
    %137 = arith.mulf %135, %136 : vector<4x256xf32>
    %138 = arith.addf %132, %137 : vector<4x256xf32>
    %139 = vector.extract_strided_slice %5 {offsets = [0, 16], sizes = [4, 1], strides = [1, 1]} : vector<4x36xf32> to vector<4x1xf32>
    %140 = vector.extract_strided_slice %4 {offsets = [0, 0], sizes = [1, 256], strides = [1, 1]} : vector<4x256xf32> to vector<1x256xf32>
    %141 = vector.broadcast %139 : vector<4x1xf32> to vector<4x256xf32>
    %142 = vector.broadcast %140 : vector<1x256xf32> to vector<4x256xf32>
    %143 = arith.mulf %141, %142 : vector<4x256xf32>
    %144 = arith.addf %138, %143 : vector<4x256xf32>
    %145 = vector.extract_strided_slice %5 {offsets = [0, 17], sizes = [4, 1], strides = [1, 1]} : vector<4x36xf32> to vector<4x1xf32>
    %146 = vector.extract_strided_slice %4 {offsets = [1, 0], sizes = [1, 256], strides = [1, 1]} : vector<4x256xf32> to vector<1x256xf32>
    %147 = vector.broadcast %145 : vector<4x1xf32> to vector<4x256xf32>
    %148 = vector.broadcast %146 : vector<1x256xf32> to vector<4x256xf32>
    %149 = arith.mulf %147, %148 : vector<4x256xf32>
    %150 = arith.addf %144, %149 : vector<4x256xf32>
    %151 = vector.extract_strided_slice %5 {offsets = [0, 18], sizes = [4, 1], strides = [1, 1]} : vector<4x36xf32> to vector<4x1xf32>
    %152 = vector.extract_strided_slice %4 {offsets = [2, 0], sizes = [1, 256], strides = [1, 1]} : vector<4x256xf32> to vector<1x256xf32>
    %153 = vector.broadcast %151 : vector<4x1xf32> to vector<4x256xf32>
    %154 = vector.broadcast %152 : vector<1x256xf32> to vector<4x256xf32>
    %155 = arith.mulf %153, %154 : vector<4x256xf32>
    %156 = arith.addf %150, %155 : vector<4x256xf32>
    %157 = vector.extract_strided_slice %5 {offsets = [0, 19], sizes = [4, 1], strides = [1, 1]} : vector<4x36xf32> to vector<4x1xf32>
    %158 = vector.extract_strided_slice %4 {offsets = [3, 0], sizes = [1, 256], strides = [1, 1]} : vector<4x256xf32> to vector<1x256xf32>
    %159 = vector.broadcast %157 : vector<4x1xf32> to vector<4x256xf32>
    %160 = vector.broadcast %158 : vector<1x256xf32> to vector<4x256xf32>
    %161 = arith.mulf %159, %160 : vector<4x256xf32>
    %162 = arith.addf %156, %161 : vector<4x256xf32>
    %c255_i32 = arith.constant 255 : i32
    %163 = tpu.dynamic_rotate %4 by %c255_i32 dim 1 : vector<4x256xf32>, i32 -> vector<4x256xf32>
    %c15_i32_20 = arith.constant 15 : i32
    %164 = vector.broadcast %c15_i32_20 : i32 to vector<1x256xi32>
    %165 = arith.cmpi slt, %2, %164 : vector<1x256xi32>
    %cst_21 = arith.constant 0.000000e+00 : f32
    %166 = vector.shape_cast %165 : vector<1x256xi1> to vector<1x256xi1>
    %167 = vector.broadcast %166 : vector<1x256xi1> to vector<4x256xi1>
    %168 = vector.broadcast %cst_21 : f32 to vector<4x256xf32>
    %169 = arith.select %167, %163, %168 : vector<4x256xi1>, vector<4x256xf32>
    %170 = vector.extract_strided_slice %5 {offsets = [0, 20], sizes = [4, 1], strides = [1, 1]} : vector<4x36xf32> to vector<4x1xf32>
    %171 = vector.extract_strided_slice %169 {offsets = [0, 0], sizes = [1, 256], strides = [1, 1]} : vector<4x256xf32> to vector<1x256xf32>
    %172 = vector.broadcast %170 : vector<4x1xf32> to vector<4x256xf32>
    %173 = vector.broadcast %171 : vector<1x256xf32> to vector<4x256xf32>
    %174 = arith.mulf %172, %173 : vector<4x256xf32>
    %175 = arith.addf %162, %174 : vector<4x256xf32>
    %176 = vector.extract_strided_slice %5 {offsets = [0, 21], sizes = [4, 1], strides = [1, 1]} : vector<4x36xf32> to vector<4x1xf32>
    %177 = vector.extract_strided_slice %169 {offsets = [1, 0], sizes = [1, 256], strides = [1, 1]} : vector<4x256xf32> to vector<1x256xf32>
    %178 = vector.broadcast %176 : vector<4x1xf32> to vector<4x256xf32>
    %179 = vector.broadcast %177 : vector<1x256xf32> to vector<4x256xf32>
    %180 = arith.mulf %178, %179 : vector<4x256xf32>
    %181 = arith.addf %175, %180 : vector<4x256xf32>
    %182 = vector.extract_strided_slice %5 {offsets = [0, 22], sizes = [4, 1], strides = [1, 1]} : vector<4x36xf32> to vector<4x1xf32>
    %183 = vector.extract_strided_slice %169 {offsets = [2, 0], sizes = [1, 256], strides = [1, 1]} : vector<4x256xf32> to vector<1x256xf32>
    %184 = vector.broadcast %182 : vector<4x1xf32> to vector<4x256xf32>
    %185 = vector.broadcast %183 : vector<1x256xf32> to vector<4x256xf32>
    %186 = arith.mulf %184, %185 : vector<4x256xf32>
    %187 = arith.addf %181, %186 : vector<4x256xf32>
    %188 = vector.extract_strided_slice %5 {offsets = [0, 23], sizes = [4, 1], strides = [1, 1]} : vector<4x36xf32> to vector<4x1xf32>
    %189 = vector.extract_strided_slice %169 {offsets = [3, 0], sizes = [1, 256], strides = [1, 1]} : vector<4x256xf32> to vector<1x256xf32>
    %190 = vector.broadcast %188 : vector<4x1xf32> to vector<4x256xf32>
    %191 = vector.broadcast %189 : vector<1x256xf32> to vector<4x256xf32>
    %192 = arith.mulf %190, %191 : vector<4x256xf32>
    %193 = arith.addf %187, %192 : vector<4x256xf32>
    %c241_i32 = arith.constant 241 : i32
    %194 = tpu.dynamic_rotate %4 by %c241_i32 dim 1 : vector<4x256xf32>, i32 -> vector<4x256xf32>
    %c15_i32_22 = arith.constant 15 : i32
    %195 = vector.broadcast %c15_i32_22 : i32 to vector<1x256xi32>
    %196 = arith.cmpi slt, %1, %195 : vector<1x256xi32>
    %c1_i32_23 = arith.constant 1 : i32
    %197 = vector.broadcast %c1_i32_23 : i32 to vector<1x256xi32>
    %198 = arith.cmpi sge, %2, %197 : vector<1x256xi32>
    %199 = arith.andi %196, %198 : vector<1x256xi1>
    %cst_24 = arith.constant 0.000000e+00 : f32
    %200 = vector.shape_cast %199 : vector<1x256xi1> to vector<1x256xi1>
    %201 = vector.broadcast %200 : vector<1x256xi1> to vector<4x256xi1>
    %202 = vector.broadcast %cst_24 : f32 to vector<4x256xf32>
    %203 = arith.select %201, %194, %202 : vector<4x256xi1>, vector<4x256xf32>
    %204 = vector.extract_strided_slice %5 {offsets = [0, 24], sizes = [4, 1], strides = [1, 1]} : vector<4x36xf32> to vector<4x1xf32>
    %205 = vector.extract_strided_slice %203 {offsets = [0, 0], sizes = [1, 256], strides = [1, 1]} : vector<4x256xf32> to vector<1x256xf32>
    %206 = vector.broadcast %204 : vector<4x1xf32> to vector<4x256xf32>
    %207 = vector.broadcast %205 : vector<1x256xf32> to vector<4x256xf32>
    %208 = arith.mulf %206, %207 : vector<4x256xf32>
    %209 = arith.addf %193, %208 : vector<4x256xf32>
    %210 = vector.extract_strided_slice %5 {offsets = [0, 25], sizes = [4, 1], strides = [1, 1]} : vector<4x36xf32> to vector<4x1xf32>
    %211 = vector.extract_strided_slice %203 {offsets = [1, 0], sizes = [1, 256], strides = [1, 1]} : vector<4x256xf32> to vector<1x256xf32>
    %212 = vector.broadcast %210 : vector<4x1xf32> to vector<4x256xf32>
    %213 = vector.broadcast %211 : vector<1x256xf32> to vector<4x256xf32>
    %214 = arith.mulf %212, %213 : vector<4x256xf32>
    %215 = arith.addf %209, %214 : vector<4x256xf32>
    %216 = vector.extract_strided_slice %5 {offsets = [0, 26], sizes = [4, 1], strides = [1, 1]} : vector<4x36xf32> to vector<4x1xf32>
    %217 = vector.extract_strided_slice %203 {offsets = [2, 0], sizes = [1, 256], strides = [1, 1]} : vector<4x256xf32> to vector<1x256xf32>
    %218 = vector.broadcast %216 : vector<4x1xf32> to vector<4x256xf32>
    %219 = vector.broadcast %217 : vector<1x256xf32> to vector<4x256xf32>
    %220 = arith.mulf %218, %219 : vector<4x256xf32>
    %221 = arith.addf %215, %220 : vector<4x256xf32>
    %222 = vector.extract_strided_slice %5 {offsets = [0, 27], sizes = [4, 1], strides = [1, 1]} : vector<4x36xf32> to vector<4x1xf32>
    %223 = vector.extract_strided_slice %203 {offsets = [3, 0], sizes = [1, 256], strides = [1, 1]} : vector<4x256xf32> to vector<1x256xf32>
    %224 = vector.broadcast %222 : vector<4x1xf32> to vector<4x256xf32>
    %225 = vector.broadcast %223 : vector<1x256xf32> to vector<4x256xf32>
    %226 = arith.mulf %224, %225 : vector<4x256xf32>
    %227 = arith.addf %221, %226 : vector<4x256xf32>
    %c240_i32 = arith.constant 240 : i32
    %228 = tpu.dynamic_rotate %4 by %c240_i32 dim 1 : vector<4x256xf32>, i32 -> vector<4x256xf32>
    %c15_i32_25 = arith.constant 15 : i32
    %229 = vector.broadcast %c15_i32_25 : i32 to vector<1x256xi32>
    %230 = arith.cmpi slt, %1, %229 : vector<1x256xi32>
    %cst_26 = arith.constant 0.000000e+00 : f32
    %231 = vector.shape_cast %230 : vector<1x256xi1> to vector<1x256xi1>
    %232 = vector.broadcast %231 : vector<1x256xi1> to vector<4x256xi1>
    %233 = vector.broadcast %cst_26 : f32 to vector<4x256xf32>
    %234 = arith.select %232, %228, %233 : vector<4x256xi1>, vector<4x256xf32>
    %235 = vector.extract_strided_slice %5 {offsets = [0, 28], sizes = [4, 1], strides = [1, 1]} : vector<4x36xf32> to vector<4x1xf32>
    %236 = vector.extract_strided_slice %234 {offsets = [0, 0], sizes = [1, 256], strides = [1, 1]} : vector<4x256xf32> to vector<1x256xf32>
    %237 = vector.broadcast %235 : vector<4x1xf32> to vector<4x256xf32>
    %238 = vector.broadcast %236 : vector<1x256xf32> to vector<4x256xf32>
    %239 = arith.mulf %237, %238 : vector<4x256xf32>
    %240 = arith.addf %227, %239 : vector<4x256xf32>
    %241 = vector.extract_strided_slice %5 {offsets = [0, 29], sizes = [4, 1], strides = [1, 1]} : vector<4x36xf32> to vector<4x1xf32>
    %242 = vector.extract_strided_slice %234 {offsets = [1, 0], sizes = [1, 256], strides = [1, 1]} : vector<4x256xf32> to vector<1x256xf32>
    %243 = vector.broadcast %241 : vector<4x1xf32> to vector<4x256xf32>
    %244 = vector.broadcast %242 : vector<1x256xf32> to vector<4x256xf32>
    %245 = arith.mulf %243, %244 : vector<4x256xf32>
    %246 = arith.addf %240, %245 : vector<4x256xf32>
    %247 = vector.extract_strided_slice %5 {offsets = [0, 30], sizes = [4, 1], strides = [1, 1]} : vector<4x36xf32> to vector<4x1xf32>
    %248 = vector.extract_strided_slice %234 {offsets = [2, 0], sizes = [1, 256], strides = [1, 1]} : vector<4x256xf32> to vector<1x256xf32>
    %249 = vector.broadcast %247 : vector<4x1xf32> to vector<4x256xf32>
    %250 = vector.broadcast %248 : vector<1x256xf32> to vector<4x256xf32>
    %251 = arith.mulf %249, %250 : vector<4x256xf32>
    %252 = arith.addf %246, %251 : vector<4x256xf32>
    %253 = vector.extract_strided_slice %5 {offsets = [0, 31], sizes = [4, 1], strides = [1, 1]} : vector<4x36xf32> to vector<4x1xf32>
    %254 = vector.extract_strided_slice %234 {offsets = [3, 0], sizes = [1, 256], strides = [1, 1]} : vector<4x256xf32> to vector<1x256xf32>
    %255 = vector.broadcast %253 : vector<4x1xf32> to vector<4x256xf32>
    %256 = vector.broadcast %254 : vector<1x256xf32> to vector<4x256xf32>
    %257 = arith.mulf %255, %256 : vector<4x256xf32>
    %258 = arith.addf %252, %257 : vector<4x256xf32>
    %c239_i32 = arith.constant 239 : i32
    %259 = tpu.dynamic_rotate %4 by %c239_i32 dim 1 : vector<4x256xf32>, i32 -> vector<4x256xf32>
    %c15_i32_27 = arith.constant 15 : i32
    %260 = vector.broadcast %c15_i32_27 : i32 to vector<1x256xi32>
    %261 = arith.cmpi slt, %1, %260 : vector<1x256xi32>
    %c15_i32_28 = arith.constant 15 : i32
    %262 = vector.broadcast %c15_i32_28 : i32 to vector<1x256xi32>
    %263 = arith.cmpi slt, %2, %262 : vector<1x256xi32>
    %264 = arith.andi %261, %263 : vector<1x256xi1>
    %cst_29 = arith.constant 0.000000e+00 : f32
    %265 = vector.shape_cast %264 : vector<1x256xi1> to vector<1x256xi1>
    %266 = vector.broadcast %265 : vector<1x256xi1> to vector<4x256xi1>
    %267 = vector.broadcast %cst_29 : f32 to vector<4x256xf32>
    %268 = arith.select %266, %259, %267 : vector<4x256xi1>, vector<4x256xf32>
    %269 = vector.extract_strided_slice %5 {offsets = [0, 32], sizes = [4, 1], strides = [1, 1]} : vector<4x36xf32> to vector<4x1xf32>
    %270 = vector.extract_strided_slice %268 {offsets = [0, 0], sizes = [1, 256], strides = [1, 1]} : vector<4x256xf32> to vector<1x256xf32>
    %271 = vector.broadcast %269 : vector<4x1xf32> to vector<4x256xf32>
    %272 = vector.broadcast %270 : vector<1x256xf32> to vector<4x256xf32>
    %273 = arith.mulf %271, %272 : vector<4x256xf32>
    %274 = arith.addf %258, %273 : vector<4x256xf32>
    %275 = vector.extract_strided_slice %5 {offsets = [0, 33], sizes = [4, 1], strides = [1, 1]} : vector<4x36xf32> to vector<4x1xf32>
    %276 = vector.extract_strided_slice %268 {offsets = [1, 0], sizes = [1, 256], strides = [1, 1]} : vector<4x256xf32> to vector<1x256xf32>
    %277 = vector.broadcast %275 : vector<4x1xf32> to vector<4x256xf32>
    %278 = vector.broadcast %276 : vector<1x256xf32> to vector<4x256xf32>
    %279 = arith.mulf %277, %278 : vector<4x256xf32>
    %280 = arith.addf %274, %279 : vector<4x256xf32>
    %281 = vector.extract_strided_slice %5 {offsets = [0, 34], sizes = [4, 1], strides = [1, 1]} : vector<4x36xf32> to vector<4x1xf32>
    %282 = vector.extract_strided_slice %268 {offsets = [2, 0], sizes = [1, 256], strides = [1, 1]} : vector<4x256xf32> to vector<1x256xf32>
    %283 = vector.broadcast %281 : vector<4x1xf32> to vector<4x256xf32>
    %284 = vector.broadcast %282 : vector<1x256xf32> to vector<4x256xf32>
    %285 = arith.mulf %283, %284 : vector<4x256xf32>
    %286 = arith.addf %280, %285 : vector<4x256xf32>
    %287 = vector.extract_strided_slice %5 {offsets = [0, 35], sizes = [4, 1], strides = [1, 1]} : vector<4x36xf32> to vector<4x1xf32>
    %288 = vector.extract_strided_slice %268 {offsets = [3, 0], sizes = [1, 256], strides = [1, 1]} : vector<4x256xf32> to vector<1x256xf32>
    %289 = vector.broadcast %287 : vector<4x1xf32> to vector<4x256xf32>
    %290 = vector.broadcast %288 : vector<1x256xf32> to vector<4x256xf32>
    %291 = arith.mulf %289, %290 : vector<4x256xf32>
    %292 = arith.addf %286, %291 : vector<4x256xf32>
    %293 = vector.broadcast %7 : vector<4x1xf32> to vector<4x256xf32>
    %294 = arith.addf %292, %293 : vector<4x256xf32>
    %cst_30 = arith.constant 0.000000e+00 : f32
    %295 = vector.broadcast %cst_30 : f32 to vector<4x256xf32>
    %296 = arith.maximumf %294, %295 : vector<4x256xf32>
    %c0_31 = arith.constant 0 : index
    %c0_32 = arith.constant 0 : index
    %297 = vector.load %arg6[%c0_31, %c0_32] : memref<4x1xf32, #tpu.memory_space<vmem>>, vector<4x1xf32>
    %cst_33 = arith.constant 0.000000e+00 : f32
    %298 = vector.broadcast %cst_33 : f32 to vector<4x256xf32>
    %c17_i32_34 = arith.constant 17 : i32
    %299 = tpu.dynamic_rotate %296 by %c17_i32_34 dim 1 : vector<4x256xf32>, i32 -> vector<4x256xf32>
    %c1_i32_35 = arith.constant 1 : i32
    %300 = vector.broadcast %c1_i32_35 : i32 to vector<1x256xi32>
    %301 = arith.cmpi sge, %1, %300 : vector<1x256xi32>
    %c1_i32_36 = arith.constant 1 : i32
    %302 = vector.broadcast %c1_i32_36 : i32 to vector<1x256xi32>
    %303 = arith.cmpi sge, %2, %302 : vector<1x256xi32>
    %304 = arith.andi %301, %303 : vector<1x256xi1>
    %cst_37 = arith.constant 0.000000e+00 : f32
    %305 = vector.shape_cast %304 : vector<1x256xi1> to vector<1x256xi1>
    %306 = vector.broadcast %305 : vector<1x256xi1> to vector<4x256xi1>
    %307 = vector.broadcast %cst_37 : f32 to vector<4x256xf32>
    %308 = arith.select %306, %299, %307 : vector<4x256xi1>, vector<4x256xf32>
    %309 = vector.extract_strided_slice %6 {offsets = [0, 0], sizes = [4, 1], strides = [1, 1]} : vector<4x36xf32> to vector<4x1xf32>
    %310 = vector.extract_strided_slice %308 {offsets = [0, 0], sizes = [1, 256], strides = [1, 1]} : vector<4x256xf32> to vector<1x256xf32>
    %311 = vector.broadcast %309 : vector<4x1xf32> to vector<4x256xf32>
    %312 = vector.broadcast %310 : vector<1x256xf32> to vector<4x256xf32>
    %313 = arith.mulf %311, %312 : vector<4x256xf32>
    %314 = arith.addf %298, %313 : vector<4x256xf32>
    %315 = vector.extract_strided_slice %6 {offsets = [0, 1], sizes = [4, 1], strides = [1, 1]} : vector<4x36xf32> to vector<4x1xf32>
    %316 = vector.extract_strided_slice %308 {offsets = [1, 0], sizes = [1, 256], strides = [1, 1]} : vector<4x256xf32> to vector<1x256xf32>
    %317 = vector.broadcast %315 : vector<4x1xf32> to vector<4x256xf32>
    %318 = vector.broadcast %316 : vector<1x256xf32> to vector<4x256xf32>
    %319 = arith.mulf %317, %318 : vector<4x256xf32>
    %320 = arith.addf %314, %319 : vector<4x256xf32>
    %321 = vector.extract_strided_slice %6 {offsets = [0, 2], sizes = [4, 1], strides = [1, 1]} : vector<4x36xf32> to vector<4x1xf32>
    %322 = vector.extract_strided_slice %308 {offsets = [2, 0], sizes = [1, 256], strides = [1, 1]} : vector<4x256xf32> to vector<1x256xf32>
    %323 = vector.broadcast %321 : vector<4x1xf32> to vector<4x256xf32>
    %324 = vector.broadcast %322 : vector<1x256xf32> to vector<4x256xf32>
    %325 = arith.mulf %323, %324 : vector<4x256xf32>
    %326 = arith.addf %320, %325 : vector<4x256xf32>
    %327 = vector.extract_strided_slice %6 {offsets = [0, 3], sizes = [4, 1], strides = [1, 1]} : vector<4x36xf32> to vector<4x1xf32>
    %328 = vector.extract_strided_slice %308 {offsets = [3, 0], sizes = [1, 256], strides = [1, 1]} : vector<4x256xf32> to vector<1x256xf32>
    %329 = vector.broadcast %327 : vector<4x1xf32> to vector<4x256xf32>
    %330 = vector.broadcast %328 : vector<1x256xf32> to vector<4x256xf32>
    %331 = arith.mulf %329, %330 : vector<4x256xf32>
    %332 = arith.addf %326, %331 : vector<4x256xf32>
    %c16_i32_38 = arith.constant 16 : i32
    %333 = tpu.dynamic_rotate %296 by %c16_i32_38 dim 1 : vector<4x256xf32>, i32 -> vector<4x256xf32>
    %c1_i32_39 = arith.constant 1 : i32
    %334 = vector.broadcast %c1_i32_39 : i32 to vector<1x256xi32>
    %335 = arith.cmpi sge, %1, %334 : vector<1x256xi32>
    %cst_40 = arith.constant 0.000000e+00 : f32
    %336 = vector.shape_cast %335 : vector<1x256xi1> to vector<1x256xi1>
    %337 = vector.broadcast %336 : vector<1x256xi1> to vector<4x256xi1>
    %338 = vector.broadcast %cst_40 : f32 to vector<4x256xf32>
    %339 = arith.select %337, %333, %338 : vector<4x256xi1>, vector<4x256xf32>
    %340 = vector.extract_strided_slice %6 {offsets = [0, 4], sizes = [4, 1], strides = [1, 1]} : vector<4x36xf32> to vector<4x1xf32>
    %341 = vector.extract_strided_slice %339 {offsets = [0, 0], sizes = [1, 256], strides = [1, 1]} : vector<4x256xf32> to vector<1x256xf32>
    %342 = vector.broadcast %340 : vector<4x1xf32> to vector<4x256xf32>
    %343 = vector.broadcast %341 : vector<1x256xf32> to vector<4x256xf32>
    %344 = arith.mulf %342, %343 : vector<4x256xf32>
    %345 = arith.addf %332, %344 : vector<4x256xf32>
    %346 = vector.extract_strided_slice %6 {offsets = [0, 5], sizes = [4, 1], strides = [1, 1]} : vector<4x36xf32> to vector<4x1xf32>
    %347 = vector.extract_strided_slice %339 {offsets = [1, 0], sizes = [1, 256], strides = [1, 1]} : vector<4x256xf32> to vector<1x256xf32>
    %348 = vector.broadcast %346 : vector<4x1xf32> to vector<4x256xf32>
    %349 = vector.broadcast %347 : vector<1x256xf32> to vector<4x256xf32>
    %350 = arith.mulf %348, %349 : vector<4x256xf32>
    %351 = arith.addf %345, %350 : vector<4x256xf32>
    %352 = vector.extract_strided_slice %6 {offsets = [0, 6], sizes = [4, 1], strides = [1, 1]} : vector<4x36xf32> to vector<4x1xf32>
    %353 = vector.extract_strided_slice %339 {offsets = [2, 0], sizes = [1, 256], strides = [1, 1]} : vector<4x256xf32> to vector<1x256xf32>
    %354 = vector.broadcast %352 : vector<4x1xf32> to vector<4x256xf32>
    %355 = vector.broadcast %353 : vector<1x256xf32> to vector<4x256xf32>
    %356 = arith.mulf %354, %355 : vector<4x256xf32>
    %357 = arith.addf %351, %356 : vector<4x256xf32>
    %358 = vector.extract_strided_slice %6 {offsets = [0, 7], sizes = [4, 1], strides = [1, 1]} : vector<4x36xf32> to vector<4x1xf32>
    %359 = vector.extract_strided_slice %339 {offsets = [3, 0], sizes = [1, 256], strides = [1, 1]} : vector<4x256xf32> to vector<1x256xf32>
    %360 = vector.broadcast %358 : vector<4x1xf32> to vector<4x256xf32>
    %361 = vector.broadcast %359 : vector<1x256xf32> to vector<4x256xf32>
    %362 = arith.mulf %360, %361 : vector<4x256xf32>
    %363 = arith.addf %357, %362 : vector<4x256xf32>
    %c15_i32_41 = arith.constant 15 : i32
    %364 = tpu.dynamic_rotate %296 by %c15_i32_41 dim 1 : vector<4x256xf32>, i32 -> vector<4x256xf32>
    %c1_i32_42 = arith.constant 1 : i32
    %365 = vector.broadcast %c1_i32_42 : i32 to vector<1x256xi32>
    %366 = arith.cmpi sge, %1, %365 : vector<1x256xi32>
    %c15_i32_43 = arith.constant 15 : i32
    %367 = vector.broadcast %c15_i32_43 : i32 to vector<1x256xi32>
    %368 = arith.cmpi slt, %2, %367 : vector<1x256xi32>
    %369 = arith.andi %366, %368 : vector<1x256xi1>
    %cst_44 = arith.constant 0.000000e+00 : f32
    %370 = vector.shape_cast %369 : vector<1x256xi1> to vector<1x256xi1>
    %371 = vector.broadcast %370 : vector<1x256xi1> to vector<4x256xi1>
    %372 = vector.broadcast %cst_44 : f32 to vector<4x256xf32>
    %373 = arith.select %371, %364, %372 : vector<4x256xi1>, vector<4x256xf32>
    %374 = vector.extract_strided_slice %6 {offsets = [0, 8], sizes = [4, 1], strides = [1, 1]} : vector<4x36xf32> to vector<4x1xf32>
    %375 = vector.extract_strided_slice %373 {offsets = [0, 0], sizes = [1, 256], strides = [1, 1]} : vector<4x256xf32> to vector<1x256xf32>
    %376 = vector.broadcast %374 : vector<4x1xf32> to vector<4x256xf32>
    %377 = vector.broadcast %375 : vector<1x256xf32> to vector<4x256xf32>
    %378 = arith.mulf %376, %377 : vector<4x256xf32>
    %379 = arith.addf %363, %378 : vector<4x256xf32>
    %380 = vector.extract_strided_slice %6 {offsets = [0, 9], sizes = [4, 1], strides = [1, 1]} : vector<4x36xf32> to vector<4x1xf32>
    %381 = vector.extract_strided_slice %373 {offsets = [1, 0], sizes = [1, 256], strides = [1, 1]} : vector<4x256xf32> to vector<1x256xf32>
    %382 = vector.broadcast %380 : vector<4x1xf32> to vector<4x256xf32>
    %383 = vector.broadcast %381 : vector<1x256xf32> to vector<4x256xf32>
    %384 = arith.mulf %382, %383 : vector<4x256xf32>
    %385 = arith.addf %379, %384 : vector<4x256xf32>
    %386 = vector.extract_strided_slice %6 {offsets = [0, 10], sizes = [4, 1], strides = [1, 1]} : vector<4x36xf32> to vector<4x1xf32>
    %387 = vector.extract_strided_slice %373 {offsets = [2, 0], sizes = [1, 256], strides = [1, 1]} : vector<4x256xf32> to vector<1x256xf32>
    %388 = vector.broadcast %386 : vector<4x1xf32> to vector<4x256xf32>
    %389 = vector.broadcast %387 : vector<1x256xf32> to vector<4x256xf32>
    %390 = arith.mulf %388, %389 : vector<4x256xf32>
    %391 = arith.addf %385, %390 : vector<4x256xf32>
    %392 = vector.extract_strided_slice %6 {offsets = [0, 11], sizes = [4, 1], strides = [1, 1]} : vector<4x36xf32> to vector<4x1xf32>
    %393 = vector.extract_strided_slice %373 {offsets = [3, 0], sizes = [1, 256], strides = [1, 1]} : vector<4x256xf32> to vector<1x256xf32>
    %394 = vector.broadcast %392 : vector<4x1xf32> to vector<4x256xf32>
    %395 = vector.broadcast %393 : vector<1x256xf32> to vector<4x256xf32>
    %396 = arith.mulf %394, %395 : vector<4x256xf32>
    %397 = arith.addf %391, %396 : vector<4x256xf32>
    %c1_i32_45 = arith.constant 1 : i32
    %398 = tpu.dynamic_rotate %296 by %c1_i32_45 dim 1 : vector<4x256xf32>, i32 -> vector<4x256xf32>
    %c1_i32_46 = arith.constant 1 : i32
    %399 = vector.broadcast %c1_i32_46 : i32 to vector<1x256xi32>
    %400 = arith.cmpi sge, %2, %399 : vector<1x256xi32>
    %cst_47 = arith.constant 0.000000e+00 : f32
    %401 = vector.shape_cast %400 : vector<1x256xi1> to vector<1x256xi1>
    %402 = vector.broadcast %401 : vector<1x256xi1> to vector<4x256xi1>
    %403 = vector.broadcast %cst_47 : f32 to vector<4x256xf32>
    %404 = arith.select %402, %398, %403 : vector<4x256xi1>, vector<4x256xf32>
    %405 = vector.extract_strided_slice %6 {offsets = [0, 12], sizes = [4, 1], strides = [1, 1]} : vector<4x36xf32> to vector<4x1xf32>
    %406 = vector.extract_strided_slice %404 {offsets = [0, 0], sizes = [1, 256], strides = [1, 1]} : vector<4x256xf32> to vector<1x256xf32>
    %407 = vector.broadcast %405 : vector<4x1xf32> to vector<4x256xf32>
    %408 = vector.broadcast %406 : vector<1x256xf32> to vector<4x256xf32>
    %409 = arith.mulf %407, %408 : vector<4x256xf32>
    %410 = arith.addf %397, %409 : vector<4x256xf32>
    %411 = vector.extract_strided_slice %6 {offsets = [0, 13], sizes = [4, 1], strides = [1, 1]} : vector<4x36xf32> to vector<4x1xf32>
    %412 = vector.extract_strided_slice %404 {offsets = [1, 0], sizes = [1, 256], strides = [1, 1]} : vector<4x256xf32> to vector<1x256xf32>
    %413 = vector.broadcast %411 : vector<4x1xf32> to vector<4x256xf32>
    %414 = vector.broadcast %412 : vector<1x256xf32> to vector<4x256xf32>
    %415 = arith.mulf %413, %414 : vector<4x256xf32>
    %416 = arith.addf %410, %415 : vector<4x256xf32>
    %417 = vector.extract_strided_slice %6 {offsets = [0, 14], sizes = [4, 1], strides = [1, 1]} : vector<4x36xf32> to vector<4x1xf32>
    %418 = vector.extract_strided_slice %404 {offsets = [2, 0], sizes = [1, 256], strides = [1, 1]} : vector<4x256xf32> to vector<1x256xf32>
    %419 = vector.broadcast %417 : vector<4x1xf32> to vector<4x256xf32>
    %420 = vector.broadcast %418 : vector<1x256xf32> to vector<4x256xf32>
    %421 = arith.mulf %419, %420 : vector<4x256xf32>
    %422 = arith.addf %416, %421 : vector<4x256xf32>
    %423 = vector.extract_strided_slice %6 {offsets = [0, 15], sizes = [4, 1], strides = [1, 1]} : vector<4x36xf32> to vector<4x1xf32>
    %424 = vector.extract_strided_slice %404 {offsets = [3, 0], sizes = [1, 256], strides = [1, 1]} : vector<4x256xf32> to vector<1x256xf32>
    %425 = vector.broadcast %423 : vector<4x1xf32> to vector<4x256xf32>
    %426 = vector.broadcast %424 : vector<1x256xf32> to vector<4x256xf32>
    %427 = arith.mulf %425, %426 : vector<4x256xf32>
    %428 = arith.addf %422, %427 : vector<4x256xf32>
    %429 = vector.extract_strided_slice %6 {offsets = [0, 16], sizes = [4, 1], strides = [1, 1]} : vector<4x36xf32> to vector<4x1xf32>
    %430 = vector.extract_strided_slice %296 {offsets = [0, 0], sizes = [1, 256], strides = [1, 1]} : vector<4x256xf32> to vector<1x256xf32>
    %431 = vector.broadcast %429 : vector<4x1xf32> to vector<4x256xf32>
    %432 = vector.broadcast %430 : vector<1x256xf32> to vector<4x256xf32>
    %433 = arith.mulf %431, %432 : vector<4x256xf32>
    %434 = arith.addf %428, %433 : vector<4x256xf32>
    %435 = vector.extract_strided_slice %6 {offsets = [0, 17], sizes = [4, 1], strides = [1, 1]} : vector<4x36xf32> to vector<4x1xf32>
    %436 = vector.extract_strided_slice %296 {offsets = [1, 0], sizes = [1, 256], strides = [1, 1]} : vector<4x256xf32> to vector<1x256xf32>
    %437 = vector.broadcast %435 : vector<4x1xf32> to vector<4x256xf32>
    %438 = vector.broadcast %436 : vector<1x256xf32> to vector<4x256xf32>
    %439 = arith.mulf %437, %438 : vector<4x256xf32>
    %440 = arith.addf %434, %439 : vector<4x256xf32>
    %441 = vector.extract_strided_slice %6 {offsets = [0, 18], sizes = [4, 1], strides = [1, 1]} : vector<4x36xf32> to vector<4x1xf32>
    %442 = vector.extract_strided_slice %296 {offsets = [2, 0], sizes = [1, 256], strides = [1, 1]} : vector<4x256xf32> to vector<1x256xf32>
    %443 = vector.broadcast %441 : vector<4x1xf32> to vector<4x256xf32>
    %444 = vector.broadcast %442 : vector<1x256xf32> to vector<4x256xf32>
    %445 = arith.mulf %443, %444 : vector<4x256xf32>
    %446 = arith.addf %440, %445 : vector<4x256xf32>
    %447 = vector.extract_strided_slice %6 {offsets = [0, 19], sizes = [4, 1], strides = [1, 1]} : vector<4x36xf32> to vector<4x1xf32>
    %448 = vector.extract_strided_slice %296 {offsets = [3, 0], sizes = [1, 256], strides = [1, 1]} : vector<4x256xf32> to vector<1x256xf32>
    %449 = vector.broadcast %447 : vector<4x1xf32> to vector<4x256xf32>
    %450 = vector.broadcast %448 : vector<1x256xf32> to vector<4x256xf32>
    %451 = arith.mulf %449, %450 : vector<4x256xf32>
    %452 = arith.addf %446, %451 : vector<4x256xf32>
    %c255_i32_48 = arith.constant 255 : i32
    %453 = tpu.dynamic_rotate %296 by %c255_i32_48 dim 1 : vector<4x256xf32>, i32 -> vector<4x256xf32>
    %c15_i32_49 = arith.constant 15 : i32
    %454 = vector.broadcast %c15_i32_49 : i32 to vector<1x256xi32>
    %455 = arith.cmpi slt, %2, %454 : vector<1x256xi32>
    %cst_50 = arith.constant 0.000000e+00 : f32
    %456 = vector.shape_cast %455 : vector<1x256xi1> to vector<1x256xi1>
    %457 = vector.broadcast %456 : vector<1x256xi1> to vector<4x256xi1>
    %458 = vector.broadcast %cst_50 : f32 to vector<4x256xf32>
    %459 = arith.select %457, %453, %458 : vector<4x256xi1>, vector<4x256xf32>
    %460 = vector.extract_strided_slice %6 {offsets = [0, 20], sizes = [4, 1], strides = [1, 1]} : vector<4x36xf32> to vector<4x1xf32>
    %461 = vector.extract_strided_slice %459 {offsets = [0, 0], sizes = [1, 256], strides = [1, 1]} : vector<4x256xf32> to vector<1x256xf32>
    %462 = vector.broadcast %460 : vector<4x1xf32> to vector<4x256xf32>
    %463 = vector.broadcast %461 : vector<1x256xf32> to vector<4x256xf32>
    %464 = arith.mulf %462, %463 : vector<4x256xf32>
    %465 = arith.addf %452, %464 : vector<4x256xf32>
    %466 = vector.extract_strided_slice %6 {offsets = [0, 21], sizes = [4, 1], strides = [1, 1]} : vector<4x36xf32> to vector<4x1xf32>
    %467 = vector.extract_strided_slice %459 {offsets = [1, 0], sizes = [1, 256], strides = [1, 1]} : vector<4x256xf32> to vector<1x256xf32>
    %468 = vector.broadcast %466 : vector<4x1xf32> to vector<4x256xf32>
    %469 = vector.broadcast %467 : vector<1x256xf32> to vector<4x256xf32>
    %470 = arith.mulf %468, %469 : vector<4x256xf32>
    %471 = arith.addf %465, %470 : vector<4x256xf32>
    %472 = vector.extract_strided_slice %6 {offsets = [0, 22], sizes = [4, 1], strides = [1, 1]} : vector<4x36xf32> to vector<4x1xf32>
    %473 = vector.extract_strided_slice %459 {offsets = [2, 0], sizes = [1, 256], strides = [1, 1]} : vector<4x256xf32> to vector<1x256xf32>
    %474 = vector.broadcast %472 : vector<4x1xf32> to vector<4x256xf32>
    %475 = vector.broadcast %473 : vector<1x256xf32> to vector<4x256xf32>
    %476 = arith.mulf %474, %475 : vector<4x256xf32>
    %477 = arith.addf %471, %476 : vector<4x256xf32>
    %478 = vector.extract_strided_slice %6 {offsets = [0, 23], sizes = [4, 1], strides = [1, 1]} : vector<4x36xf32> to vector<4x1xf32>
    %479 = vector.extract_strided_slice %459 {offsets = [3, 0], sizes = [1, 256], strides = [1, 1]} : vector<4x256xf32> to vector<1x256xf32>
    %480 = vector.broadcast %478 : vector<4x1xf32> to vector<4x256xf32>
    %481 = vector.broadcast %479 : vector<1x256xf32> to vector<4x256xf32>
    %482 = arith.mulf %480, %481 : vector<4x256xf32>
    %483 = arith.addf %477, %482 : vector<4x256xf32>
    %c241_i32_51 = arith.constant 241 : i32
    %484 = tpu.dynamic_rotate %296 by %c241_i32_51 dim 1 : vector<4x256xf32>, i32 -> vector<4x256xf32>
    %c15_i32_52 = arith.constant 15 : i32
    %485 = vector.broadcast %c15_i32_52 : i32 to vector<1x256xi32>
    %486 = arith.cmpi slt, %1, %485 : vector<1x256xi32>
    %c1_i32_53 = arith.constant 1 : i32
    %487 = vector.broadcast %c1_i32_53 : i32 to vector<1x256xi32>
    %488 = arith.cmpi sge, %2, %487 : vector<1x256xi32>
    %489 = arith.andi %486, %488 : vector<1x256xi1>
    %cst_54 = arith.constant 0.000000e+00 : f32
    %490 = vector.shape_cast %489 : vector<1x256xi1> to vector<1x256xi1>
    %491 = vector.broadcast %490 : vector<1x256xi1> to vector<4x256xi1>
    %492 = vector.broadcast %cst_54 : f32 to vector<4x256xf32>
    %493 = arith.select %491, %484, %492 : vector<4x256xi1>, vector<4x256xf32>
    %494 = vector.extract_strided_slice %6 {offsets = [0, 24], sizes = [4, 1], strides = [1, 1]} : vector<4x36xf32> to vector<4x1xf32>
    %495 = vector.extract_strided_slice %493 {offsets = [0, 0], sizes = [1, 256], strides = [1, 1]} : vector<4x256xf32> to vector<1x256xf32>
    %496 = vector.broadcast %494 : vector<4x1xf32> to vector<4x256xf32>
    %497 = vector.broadcast %495 : vector<1x256xf32> to vector<4x256xf32>
    %498 = arith.mulf %496, %497 : vector<4x256xf32>
    %499 = arith.addf %483, %498 : vector<4x256xf32>
    %500 = vector.extract_strided_slice %6 {offsets = [0, 25], sizes = [4, 1], strides = [1, 1]} : vector<4x36xf32> to vector<4x1xf32>
    %501 = vector.extract_strided_slice %493 {offsets = [1, 0], sizes = [1, 256], strides = [1, 1]} : vector<4x256xf32> to vector<1x256xf32>
    %502 = vector.broadcast %500 : vector<4x1xf32> to vector<4x256xf32>
    %503 = vector.broadcast %501 : vector<1x256xf32> to vector<4x256xf32>
    %504 = arith.mulf %502, %503 : vector<4x256xf32>
    %505 = arith.addf %499, %504 : vector<4x256xf32>
    %506 = vector.extract_strided_slice %6 {offsets = [0, 26], sizes = [4, 1], strides = [1, 1]} : vector<4x36xf32> to vector<4x1xf32>
    %507 = vector.extract_strided_slice %493 {offsets = [2, 0], sizes = [1, 256], strides = [1, 1]} : vector<4x256xf32> to vector<1x256xf32>
    %508 = vector.broadcast %506 : vector<4x1xf32> to vector<4x256xf32>
    %509 = vector.broadcast %507 : vector<1x256xf32> to vector<4x256xf32>
    %510 = arith.mulf %508, %509 : vector<4x256xf32>
    %511 = arith.addf %505, %510 : vector<4x256xf32>
    %512 = vector.extract_strided_slice %6 {offsets = [0, 27], sizes = [4, 1], strides = [1, 1]} : vector<4x36xf32> to vector<4x1xf32>
    %513 = vector.extract_strided_slice %493 {offsets = [3, 0], sizes = [1, 256], strides = [1, 1]} : vector<4x256xf32> to vector<1x256xf32>
    %514 = vector.broadcast %512 : vector<4x1xf32> to vector<4x256xf32>
    %515 = vector.broadcast %513 : vector<1x256xf32> to vector<4x256xf32>
    %516 = arith.mulf %514, %515 : vector<4x256xf32>
    %517 = arith.addf %511, %516 : vector<4x256xf32>
    %c240_i32_55 = arith.constant 240 : i32
    %518 = tpu.dynamic_rotate %296 by %c240_i32_55 dim 1 : vector<4x256xf32>, i32 -> vector<4x256xf32>
    %c15_i32_56 = arith.constant 15 : i32
    %519 = vector.broadcast %c15_i32_56 : i32 to vector<1x256xi32>
    %520 = arith.cmpi slt, %1, %519 : vector<1x256xi32>
    %cst_57 = arith.constant 0.000000e+00 : f32
    %521 = vector.shape_cast %520 : vector<1x256xi1> to vector<1x256xi1>
    %522 = vector.broadcast %521 : vector<1x256xi1> to vector<4x256xi1>
    %523 = vector.broadcast %cst_57 : f32 to vector<4x256xf32>
    %524 = arith.select %522, %518, %523 : vector<4x256xi1>, vector<4x256xf32>
    %525 = vector.extract_strided_slice %6 {offsets = [0, 28], sizes = [4, 1], strides = [1, 1]} : vector<4x36xf32> to vector<4x1xf32>
    %526 = vector.extract_strided_slice %524 {offsets = [0, 0], sizes = [1, 256], strides = [1, 1]} : vector<4x256xf32> to vector<1x256xf32>
    %527 = vector.broadcast %525 : vector<4x1xf32> to vector<4x256xf32>
    %528 = vector.broadcast %526 : vector<1x256xf32> to vector<4x256xf32>
    %529 = arith.mulf %527, %528 : vector<4x256xf32>
    %530 = arith.addf %517, %529 : vector<4x256xf32>
    %531 = vector.extract_strided_slice %6 {offsets = [0, 29], sizes = [4, 1], strides = [1, 1]} : vector<4x36xf32> to vector<4x1xf32>
    %532 = vector.extract_strided_slice %524 {offsets = [1, 0], sizes = [1, 256], strides = [1, 1]} : vector<4x256xf32> to vector<1x256xf32>
    %533 = vector.broadcast %531 : vector<4x1xf32> to vector<4x256xf32>
    %534 = vector.broadcast %532 : vector<1x256xf32> to vector<4x256xf32>
    %535 = arith.mulf %533, %534 : vector<4x256xf32>
    %536 = arith.addf %530, %535 : vector<4x256xf32>
    %537 = vector.extract_strided_slice %6 {offsets = [0, 30], sizes = [4, 1], strides = [1, 1]} : vector<4x36xf32> to vector<4x1xf32>
    %538 = vector.extract_strided_slice %524 {offsets = [2, 0], sizes = [1, 256], strides = [1, 1]} : vector<4x256xf32> to vector<1x256xf32>
    %539 = vector.broadcast %537 : vector<4x1xf32> to vector<4x256xf32>
    %540 = vector.broadcast %538 : vector<1x256xf32> to vector<4x256xf32>
    %541 = arith.mulf %539, %540 : vector<4x256xf32>
    %542 = arith.addf %536, %541 : vector<4x256xf32>
    %543 = vector.extract_strided_slice %6 {offsets = [0, 31], sizes = [4, 1], strides = [1, 1]} : vector<4x36xf32> to vector<4x1xf32>
    %544 = vector.extract_strided_slice %524 {offsets = [3, 0], sizes = [1, 256], strides = [1, 1]} : vector<4x256xf32> to vector<1x256xf32>
    %545 = vector.broadcast %543 : vector<4x1xf32> to vector<4x256xf32>
    %546 = vector.broadcast %544 : vector<1x256xf32> to vector<4x256xf32>
    %547 = arith.mulf %545, %546 : vector<4x256xf32>
    %548 = arith.addf %542, %547 : vector<4x256xf32>
    %c239_i32_58 = arith.constant 239 : i32
    %549 = tpu.dynamic_rotate %296 by %c239_i32_58 dim 1 : vector<4x256xf32>, i32 -> vector<4x256xf32>
    %c15_i32_59 = arith.constant 15 : i32
    %550 = vector.broadcast %c15_i32_59 : i32 to vector<1x256xi32>
    %551 = arith.cmpi slt, %1, %550 : vector<1x256xi32>
    %c15_i32_60 = arith.constant 15 : i32
    %552 = vector.broadcast %c15_i32_60 : i32 to vector<1x256xi32>
    %553 = arith.cmpi slt, %2, %552 : vector<1x256xi32>
    %554 = arith.andi %551, %553 : vector<1x256xi1>
    %cst_61 = arith.constant 0.000000e+00 : f32
    %555 = vector.shape_cast %554 : vector<1x256xi1> to vector<1x256xi1>
    %556 = vector.broadcast %555 : vector<1x256xi1> to vector<4x256xi1>
    %557 = vector.broadcast %cst_61 : f32 to vector<4x256xf32>
    %558 = arith.select %556, %549, %557 : vector<4x256xi1>, vector<4x256xf32>
    %559 = vector.extract_strided_slice %6 {offsets = [0, 32], sizes = [4, 1], strides = [1, 1]} : vector<4x36xf32> to vector<4x1xf32>
    %560 = vector.extract_strided_slice %558 {offsets = [0, 0], sizes = [1, 256], strides = [1, 1]} : vector<4x256xf32> to vector<1x256xf32>
    %561 = vector.broadcast %559 : vector<4x1xf32> to vector<4x256xf32>
    %562 = vector.broadcast %560 : vector<1x256xf32> to vector<4x256xf32>
    %563 = arith.mulf %561, %562 : vector<4x256xf32>
    %564 = arith.addf %548, %563 : vector<4x256xf32>
    %565 = vector.extract_strided_slice %6 {offsets = [0, 33], sizes = [4, 1], strides = [1, 1]} : vector<4x36xf32> to vector<4x1xf32>
    %566 = vector.extract_strided_slice %558 {offsets = [1, 0], sizes = [1, 256], strides = [1, 1]} : vector<4x256xf32> to vector<1x256xf32>
    %567 = vector.broadcast %565 : vector<4x1xf32> to vector<4x256xf32>
    %568 = vector.broadcast %566 : vector<1x256xf32> to vector<4x256xf32>
    %569 = arith.mulf %567, %568 : vector<4x256xf32>
    %570 = arith.addf %564, %569 : vector<4x256xf32>
    %571 = vector.extract_strided_slice %6 {offsets = [0, 34], sizes = [4, 1], strides = [1, 1]} : vector<4x36xf32> to vector<4x1xf32>
    %572 = vector.extract_strided_slice %558 {offsets = [2, 0], sizes = [1, 256], strides = [1, 1]} : vector<4x256xf32> to vector<1x256xf32>
    %573 = vector.broadcast %571 : vector<4x1xf32> to vector<4x256xf32>
    %574 = vector.broadcast %572 : vector<1x256xf32> to vector<4x256xf32>
    %575 = arith.mulf %573, %574 : vector<4x256xf32>
    %576 = arith.addf %570, %575 : vector<4x256xf32>
    %577 = vector.extract_strided_slice %6 {offsets = [0, 35], sizes = [4, 1], strides = [1, 1]} : vector<4x36xf32> to vector<4x1xf32>
    %578 = vector.extract_strided_slice %558 {offsets = [3, 0], sizes = [1, 256], strides = [1, 1]} : vector<4x256xf32> to vector<1x256xf32>
    %579 = vector.broadcast %577 : vector<4x1xf32> to vector<4x256xf32>
    %580 = vector.broadcast %578 : vector<1x256xf32> to vector<4x256xf32>
    %581 = arith.mulf %579, %580 : vector<4x256xf32>
    %582 = arith.addf %576, %581 : vector<4x256xf32>
    %583 = vector.broadcast %297 : vector<4x1xf32> to vector<4x256xf32>
    %584 = arith.addf %582, %583 : vector<4x256xf32>
    %585 = arith.addf %584, %4 : vector<4x256xf32>
    %cst_62 = arith.constant 0.000000e+00 : f32
    %586 = vector.broadcast %cst_62 : f32 to vector<4x256xf32>
    %587 = arith.maximumf %585, %586 : vector<4x256xf32>
    %cst_63 = arith.constant dense<0xFF800000> : vector<4xf32>
    %588 = vector.multi_reduction <maximumf>, %587, %cst_63 [1] : vector<4x256xf32> to vector<4xf32>
    %589 = vector.shape_cast %588 : vector<4xf32> to vector<4x1xf32>
    %cst_64 = arith.constant dense<0.000000e+00> : vector<4xf32>
    %590 = vector.multi_reduction <add>, %587, %cst_64 [1] : vector<4x256xf32> to vector<4xf32>
    %591 = vector.shape_cast %590 : vector<4xf32> to vector<4x1xf32>
    %cst_65 = arith.constant 3.906250e-03 : f32
    %592 = vector.broadcast %cst_65 : f32 to vector<4x1xf32>
    %593 = arith.mulf %591, %592 : vector<4x1xf32>
    %c0_66 = arith.constant 0 : index
    %c0_67 = arith.constant 0 : index
    %594 = vector.load %arg7[%c0_66, %c0_67] : memref<4x4xf32, #tpu.memory_space<vmem>>, vector<4x4xf32>
    %cst_68 = arith.constant 0.000000e+00 : f32
    %595 = vector.broadcast %cst_68 : f32 to vector<4x1xf32>
    %596 = vector.extract_strided_slice %594 {offsets = [0, 0], sizes = [4, 1], strides = [1, 1]} : vector<4x4xf32> to vector<4x1xf32>
    %597 = vector.extract_strided_slice %593 {offsets = [0, 0], sizes = [1, 1], strides = [1, 1]} : vector<4x1xf32> to vector<1x1xf32>
    %598 = vector.broadcast %597 : vector<1x1xf32> to vector<4x1xf32>
    %599 = arith.mulf %596, %598 : vector<4x1xf32>
    %600 = arith.addf %595, %599 : vector<4x1xf32>
    %601 = vector.extract_strided_slice %594 {offsets = [0, 1], sizes = [4, 1], strides = [1, 1]} : vector<4x4xf32> to vector<4x1xf32>
    %602 = vector.extract_strided_slice %593 {offsets = [1, 0], sizes = [1, 1], strides = [1, 1]} : vector<4x1xf32> to vector<1x1xf32>
    %603 = vector.broadcast %602 : vector<1x1xf32> to vector<4x1xf32>
    %604 = arith.mulf %601, %603 : vector<4x1xf32>
    %605 = arith.addf %600, %604 : vector<4x1xf32>
    %606 = vector.extract_strided_slice %594 {offsets = [0, 2], sizes = [4, 1], strides = [1, 1]} : vector<4x4xf32> to vector<4x1xf32>
    %607 = vector.extract_strided_slice %593 {offsets = [2, 0], sizes = [1, 1], strides = [1, 1]} : vector<4x1xf32> to vector<1x1xf32>
    %608 = vector.broadcast %607 : vector<1x1xf32> to vector<4x1xf32>
    %609 = arith.mulf %606, %608 : vector<4x1xf32>
    %610 = arith.addf %605, %609 : vector<4x1xf32>
    %611 = vector.extract_strided_slice %594 {offsets = [0, 3], sizes = [4, 1], strides = [1, 1]} : vector<4x4xf32> to vector<4x1xf32>
    %612 = vector.extract_strided_slice %593 {offsets = [3, 0], sizes = [1, 1], strides = [1, 1]} : vector<4x1xf32> to vector<1x1xf32>
    %613 = vector.broadcast %612 : vector<1x1xf32> to vector<4x1xf32>
    %614 = arith.mulf %611, %613 : vector<4x1xf32>
    %615 = arith.addf %610, %614 : vector<4x1xf32>
    %616 = arith.negf %615 : vector<4x1xf32>
    %617 = math.exp %616 : vector<4x1xf32>
    %cst_69 = arith.constant 1.000000e+00 : f32
    %618 = vector.broadcast %cst_69 : f32 to vector<4x1xf32>
    %619 = arith.addf %618, %617 : vector<4x1xf32>
    %620 = arith.divf %618, %619 : vector<4x1xf32>
    %621 = arith.mulf %589, %620 : vector<4x1xf32>
    %622 = vector.broadcast %621 : vector<4x1xf32> to vector<4x256xf32>
    %623 = arith.minimumf %587, %622 : vector<4x256xf32>
    %c0_70 = arith.constant 0 : index
    %c0_71 = arith.constant 0 : index
    %c0_72 = arith.constant 0 : index
    %624 = vector.load %arg8[%c0_70, %c0_71, %c0_72] : memref<1x4x256xf32, #tpu.memory_space<vmem>>, vector<1x4x256xf32>
    %625 = vector.shape_cast %624 : vector<1x4x256xf32> to vector<4x256xf32>
    %626 = vector.shape_cast %623 : vector<4x256xf32> to vector<1x4x256xf32>
    tpu.vector_store %arg8[%c0_70, %c0_71, %c0_72], %626 {strides = array<i32>} : memref<1x4x256xf32, #tpu.memory_space<vmem>>, vector<1x4x256xf32>,
    return
  }
  func.func @transform_0(%arg0: i32) -> (i32, i32, i32) {
    %c0_i32 = arith.constant 0 : i32
    %c0_i32_0 = arith.constant 0 : i32
    %c0_i32_1 = arith.constant 0 : i32
    return %arg0, %c0_i32, %c0_i32_0 : i32, i32, i32
  }
  func.func @transform_1(%arg0: i32) -> (i32, i32) {
    %c0_i32 = arith.constant 0 : i32
    %c0_i32_0 = arith.constant 0 : i32
    %c0_i32_1 = arith.constant 0 : i32
    return %c0_i32, %c0_i32_0 : i32, i32
  }
  func.func @transform_2(%arg0: i32) -> (i32, i32) {
    %c0_i32 = arith.constant 0 : i32
    %c0_i32_0 = arith.constant 0 : i32
    %c0_i32_1 = arith.constant 0 : i32
    return %c0_i32, %c0_i32_0 : i32, i32
  }
  func.func @transform_3(%arg0: i32) -> (i32, i32) {
    %c0_i32 = arith.constant 0 : i32
    %c0_i32_0 = arith.constant 0 : i32
    %c0_i32_1 = arith.constant 0 : i32
    return %c0_i32, %c0_i32_0 : i32, i32
  }
  func.func @transform_4(%arg0: i32) -> (i32, i32) {
    %c0_i32 = arith.constant 0 : i32
    %c0_i32_0 = arith.constant 0 : i32
    %c0_i32_1 = arith.constant 0 : i32
    return %c0_i32, %c0_i32_0 : i32, i32
  }
  func.func @transform_5(%arg0: i32) -> (i32, i32) {
    %c0_i32 = arith.constant 0 : i32
    %c0_i32_0 = arith.constant 0 : i32
    %c0_i32_1 = arith.constant 0 : i32
    return %c0_i32, %c0_i32_0 : i32, i32
  }
  func.func @transform_6(%arg0: i32) -> (i32, i32) {
    %c0_i32 = arith.constant 0 : i32
    %c0_i32_0 = arith.constant 0 : i32
    %c0_i32_1 = arith.constant 0 : i32
    return %c0_i32, %c0_i32_0 : i32, i32
  }
  func.func @transform_7(%arg0: i32) -> (i32, i32, i32) {
    %c0_i32 = arith.constant 0 : i32
    %c0_i32_0 = arith.constant 0 : i32
    %c0_i32_1 = arith.constant 0 : i32
    return %arg0, %c0_i32, %c0_i32_0 : i32, i32, i32
  }
}

</mosaic_0001>

<bundles_post_ra>
// kernel: tpu_custom_call.1
= control target key start
LH: loop header
LB: loop body
LE: loop exit
PB: predicated region body
PF: predicated region fallthrough
CT: control target
= control target key end

     0   :  { %12 = vsyncpa [#allocation3], 0  ;;  %s3360_s0 = inlined_call_operand.hbm [shape: f32[2,4,256], index: 0, kind: input, shape index: {}]   ;;  %s3361_s1 = inlined_call_operand.vmem [shape: s32[2,256], index: 1, kind: input, shape index: {}]   ;;  %s3362_s2 = inlined_call_operand.vmem [shape: f32[4,36], index: 2, kind: input, shape index: {}]   ;;  %s3363_s3 = inlined_call_operand.vmem [shape: f32[4,1], index: 3, kind: input, shape index: {}]   ;;  %s3364_s4 = inlined_call_operand.vmem [shape: f32[4,36], index: 4, kind: input, shape index: {}]   ;;  %s3365_s5 = inlined_call_operand.vmem [shape: f32[4,1], index: 5, kind: input, shape index: {}]   ;;  %s3366_s6 = inlined_call_operand.vmem [shape: f32[4,4], index: 6, kind: input, shape index: {}]   ;;  %s3367_s7 = inlined_call_operand.hbm [shape: f32[2,4,256], index: 7, kind: output, shape index: {}]  }
   0x1   :  { %14 = vsyncpa [#allocation3 + $0x1], 0 }
   0x2   :  { %15 = vsyncpa [#allocation4], 0 }
   0x3   :  { %17 = vsyncpa [#allocation4 + $0x1], 0  ;;  %s2350_s24 = smov 0   ;;  %s2352_s25 = smov 0  }
   0x4   :  { %s2354_s26 = smov 0   ;;  %s2356_s27 = smov 0  }
   0x5 LB: > { %s2371_s28 = sadd.s32 4294967295, %s2260_s27   ;;  %s1971_s29 = sadd.s32 4294967294, %s2260_s27   ;;  %s2260_s27 = sphi %s2356_s27, %s3417_s27   ;;  %s2256_s26 = sphi %s2354_s26, %s3416_s26   ;;  %s2252_s25 = sphi %s2352_s25, %s3415_s25   ;;  %s2248_s24 = sphi %s2350_s24, %s3414_s24  }
   0x6   : > { %s2375_s30 = sadd.s32 1, %s2260_s27   ;;  %s30_s8 = sadd.s32 1, %s2256_s26 }
   0x7   : > { %s27_s9 = ssub.s32 %s2260_s27, %s2375_s30  ;;  %p37_p0 = scmp.ne.s32.totalorder %s2256_s26, %s2252_s25 }
   0x8   : > { %p28_p1 = scmp.eq.s32.totalorder %s27_s9, 0  ;;  %p38_p2 = scmp.eq.s32.totalorder %s2260_s27, 0 }
   0x9   : > { %p43_p3 = scmp.ne.s32.totalorder %s2252_s25, %s2248_s24  ;;  %p44_p4 = scmp.eq.s32.totalorder %s2371_s28, 0 }
   0xa   : > { %s2387_s10 = scalar_select %p28_p1, %s2256_s26, %s30_s8  }
   0xb   : > { %p2389_p5 = por %p38_p2, %p37_p0  ;;  %p2393_p6 = por %p44_p4, %p43_p3 }
   0xc   : > { %p193_p7 = scmp.eq.s32.totalorder %s2371_s28, 1  ;;  %p199_p8 = scmp.eq.s32.totalorder %s1971_s29, 1 }
   0xd   : > { %p2002_p10 = scmp.lt.s32.totalorder %s2260_s27, 2  ;;  %s237_s15 = sand.u32 1, %s2256_s26  }
   0xe   : > { %p2400_p11 = por %p193_p7, %p37_p0  ;;  %p2404_p12 = por %p199_p8, %p43_p3 }
   0xf   : > { %s1988_s16 = sshll.u32 %s2260_s27, 7  ;;  %s1974_s17 = sshll.u32 %s237_s15, 3 }
  0x10   : > { %s3385_s13 = scalar_select %p2400_p11, 1, 0 }
  0x11   : > { %s3386_s14 = scalar_select %p2404_p12, 1, 0 }
  0x12   : > { %s2413_s20 = scalar_lea.hbm %s3360_s0, %s1988_s16  ;;  %s241_s21 = scalar_lea.vmem [#allocation2], %s1974_s17 }
  0x13   : > { %s249_s22 = sshll.u32 %s241_s21, 4  ;;  %p2417_p13 = pnand %p2002_p10, %p2389_p5  ;;  %s2421_s22 = int_to_ptr.vmem [resolvable:$true] %s249_s22 }
  0x14   : > { %s238_s29 = scalar_lea.sflag [#allocation3], %s237_s15  ;;  %s2164_s8 = scalar_lea.hbm %s2413_s20, 128 }
  0x15   : > { %p2165_p2 = scmp.ne.s32.totalorder %s2413_s20, %s2164_s8  ;;  %p2166_p3 = pneg %p2417_p13 }
  0x16   : > { %s2169_s16 = scalar_lea.hbm %s3360_s0, 256  ;;  %p2170_p5 = scmp.lt.u32.totalorder %s2413_s20, %s3360_s0 }
  0x17   : > { %p2167_p4 = pnand %p2166_p3, %p2165_p2  ;;  %p2171_p8 = scmp.lt.u32.totalorder %s2169_s16, %s2164_s8 }
  0x18   : > { %p2173_p9 = scmp.lt.u32.totalorder %s2164_s8, %s2413_s20 }
  0x19   : > { %p2168_p7 = pneg %p2167_p4  ;;  %p2172_p10 = por %p2171_p8, %p2170_p5 }
  0x1b   : > { %p2174_p0 = por %p2173_p9, %p2172_p10 }
  0x1d   : > { %p2175_p1 = pnand %p2174_p0, %p2168_p7 }
  0x1f   : > { %2178 = shalt.err (!%p2175_p1)
}
  0x20   : > { %s2179_s15 = scalar_lea.vmem %s2421_s22, 128  ;;  %s2262_s19 = smov [#allocation2]  }
  0x21   : > { %p2180_p2 = scmp.ne.s32.totalorder %s2421_s22, %s2179_s15  ;;  %s2184_s21 = sshll.u32 %s2262_s19, 4  ;;  %s2185_s21 = int_to_ptr.vmem [resolvable:$false] %s2184_s21 }
  0x22   : > { %s2186_s9 = scalar_lea.vmem %s2185_s21, 256  ;;  %p2187_p11 = scmp.lt.s32.totalorder %s2421_s22, %s2185_s21 }
  0x23   : > { %p2182_p4 = pnand %p2180_p2, %p2166_p3  ;;  %p2188_p5 = scmp.lt.s32.totalorder %s2186_s9, %s2179_s15 }
  0x25   : > { %p2183_p12 = pneg %p2182_p4  ;;  %p2189_p8 = por %p2188_p5, %p2187_p11 }
  0x27   : > { %p2190_p9 = pnand %p2189_p8, %p2183_p12 }
  0x29   : > { %2193 = shalt.err (!%p2190_p9)
}
  0x2a   : > { %1997 = dma.hbm_to_vmem [thread:$0]  (!%p2417_p13), %s2413_s20, 128, %s2421_s22, %s238_s29  }
  0x2b   : > { %p3388_p0 = scmp.lt.s32.totalorder %s2260_s27, 3  ;;  %p3389_p1 = scmp.ge.s32.totalorder %s2260_s27, 1 }
  0x2d   : > { %p255_p3 = pnand %p3389_p1, %p3388_p0 }
  0x2f   : > { %258 = sbr.rel (%p255_p3) target bundleno = 1054 (0x41e), region = 48 }
  0x36   : > { %s2455_s8 = sand.u32 1, %s2252_s25  }
  0x37   : > { %s1978_s11 = sshll.u32 %s2455_s8, 3  ;;  %s261_s16 = scalar_lea.sflag [#allocation3], %s2455_s8 }
  0x38   : > { %s2461_s23 = scalar_lea.vmem [#allocation2], %s1978_s11 }
  0x39   : > { %2239 = dma.done.wait (%p2393_p6), %s261_s16, 128  }
  0x3a   : > { %2241 = vsyncadd (%p2393_p6), %s261_s16, 4294967168  ;;  %v2263_v0 = vmov 2   ;;  %v2264_v1 = vmov 0   ;;  %v2472_v2 = vld [vmem:[%s3362_s2] sm:$0xf]  ;;  %s2265_s12 = smov 17   ;;  %v307_v41 = vlaneseq }
  0x3b   : > { %2084 = vset.pattern.permute.xlu1 %v2263_v0  ;;  %2082 = vset.pattern.permute.xlu0 %v2264_v1  ;;  %v2477_v3 = vld [vmem:[%s2461_s23] sm:$0xff]  ;;  %v2266_v4 = vmov 1   ;;  %v2267_v6 = vmov 4   ;;  %v2268_v7 = vmov 3   ;;  %s2269_s29 = smov 16   ;;  %v2270_v8 = vmov 6  }
  0x3c   : > { %373 = vperm.xlu1 %2084, %v2472_v2   ;;  %341 = vperm.xlu0 %2082, %v2472_v2   ;;  %v2484_v5 = vcombine.high %v2477_v3, %v2477_v3  ;;  %v2271_v9 = vmov 5   ;;  %v2272_v10 = vmov 7   ;;  %v2273_v11 = vmov 9   ;;  %s2277_s17 = smov 15   ;;  %s2283_s18 = smov 1  }
  0x3d   : > { %v2274_v12 = vmov 10   ;;  %v2275_v13 = vmov 8   ;;  %v2276_v14 = vmov 13   ;;  %v2278_v15 = vmov 11   ;;  %s2285_s15 = smov 127   ;;  %s2287_s19 = smov 113  }
  0x3e   : > { %3390 = vst [vmem:[#allocation8_spill] sm:$0xff] %v2484_v5  ;;  %v2279_v16 = vmov 14   ;;  %v2280_v17 = vmov 17   ;;  %v2281_v18 = vmov 12   ;;  %v2282_v19 = vmov 20   ;;  %s2302_s22 = smov 112  }
  0x3f   : > { %v2284_v20 = vmov 15   ;;  %v2286_v21 = vmov 23   ;;  %v2288_v22 = vmov 26   ;;  %v2289_v23 = vmov 16   ;;  %v2561_v32 = vld [vmem:[%s3364_s4] sm:$0xf] }
  0x40   : > { %303 = vrot.lane.b32.xlu1 %v2477_v3, %s2265_s12  ;;  %2083 = vset.pattern.permute.xlu0 %v2266_v4  ;;  %v2290_v24 = vmov 18   ;;  %v2291_v25 = vmov 29   ;;  %v2292_v26 = vmov 19   ;;  %v2293_v27 = vmov 30   ;;  %v2587_v37 = vld [vmem:[%s3361_s1] sm:$0xf] }
  0x41   : > { %357 = vperm.xlu0 %2083, %v2472_v2   ;;  %2086 = vset.pattern.permute.xlu1 %v2267_v6  ;;  %v2294_v28 = vmov 21   ;;  %v2295_v29 = vmov 33   ;;  %v2296_v30 = vmov 34   ;;  %v2297_v31 = vmov 22   ;;  %s2305_s21 = smov 111   ;;  %p3411_p11 = scmp.ne.s32.totalorder %s3385_s13, 0 }
  0x42   : > { %v2298_v33 = vmov 24   ;;  %v2299_v34 = vmov 25   ;;  %v3373_v35 = vmov 27   ;;  %v3372_v36 = vmov 28   ;;  %v299_v60 = vld [vmem:[%s3363_s3] sm:$0xf] }
  0x43   : > { %v3371_v38 = vmov 31   ;;  %vm312_vm0 = vcmp.ge.s32.totalorder %v2587_v37, 1  ;;  %v3370_v43 = vmov 32   ;;  %v2613_v44 = vshrl.u32 %v307_v41, 7 }
  0x44   : > { %305 = vrot.lane.b32.xlu1 %v2484_v5, %s2265_s12  ;;  %v2600_v39 = vsel %vm312_vm0, 1, %v2264_v1  ;;  %v3369_v50 = vmov 35   ;;  %v2637_v55 = vand.u32 127, %v307_v41  ;;  %vm502_vm4 = vcmp.lt.s32.totalorder %v2587_v37, 15 }
  0x45   : > { %2085 = vset.pattern.permute.xlu0 %v2268_v7  ;;  %v1980_v40 = vrot.slane %v2600_v39, 9  ;;  %v2624_v46 = vsub.s32 0, %v2613_v44  ;;  %v2629_v48 = vsub.s32 2, %v2613_v44  ;;  %v2663_v63 = vsel %vm502_vm4, 1, %v2264_v1 }
  0x46   : > { %389 = vperm.xlu0 %2085, %v2472_v2   ;;  %vm309_vm3 = vcmp.lt.s32.totalorder %v2637_v55, 17  ;;  %vm408_vm8 = vcmp.lt.s32.totalorder %v2637_v55, 16  ;;  %vm499_vm12 = vcmp.lt.s32.totalorder %v2637_v55, 15  ;;  %vm3376_vm15 = vcmp.lt.s32.totalorder %v2637_v55, 1 }
  0x47   : > { %vm2608_vm1 = vcmp.ne.s32.totalorder %v1980_v40, 0 }
  0x48   : > { %432 = vperm.xlu1 %2086, %v2472_v2   ;;  %vm317_vm2 = vmand %vm312_vm0, %vm2608_vm1 }
  0x49   : > { %v318_v49 = vsel %vm317_vm2, 1, %v2264_v1 }
  0x4a   : > { %404 = vrot.lane.b32.xlu0 %v2477_v3, %s2269_s29  ;;  %v322_v51 = vrot.slane %v318_v49, %v2624_v46  ;;  %v326_v54 = vrot.slane %v318_v49, %v2629_v48 }
  0x4b   : > { %2088 = vset.pattern.permute.xlu0 %v2270_v8 }
  0x4c   : > { %2087 = vset.pattern.permute.xlu1 %v2271_v9  ;;  %v2640_v56 = vrot.slane %v322_v51, %v2624_v46  ;;  %v2643_v57 = vrot.slane %v326_v54, %v2624_v46 }
  0x4d   : > { %448 = vperm.xlu1 %2087, %v2472_v2  }
  0x4e   : > { %464 = vperm.xlu0 %2088, %v2472_v2   ;;  %vm335_vm5 = vcmp.eq.s32.totalorder %v2640_v56, 1  ;;  %vm336_vm6 = vcmp.eq.s32.totalorder %v2643_v57, 1 }
  0x51   : > { %406 = vrot.lane.b32.xlu1 %v2484_v5, %s2269_s29 }
  0x52   : > { %2089 = vset.pattern.permute.xlu1 %v2272_v10  ;;  %2091 = vset.pattern.permute.xlu0 %v2273_v11 }
  0x53   : > { %546 = vperm.xlu0 %2091, %v2472_v2  }
  0x55   : > { %480 = vperm.xlu1 %2089, %v2472_v2  }
  0x57   : > { %2092 = vset.pattern.permute.xlu0 %v2274_v12 }
  0x58   : > { %562 = vperm.xlu0 %2092, %v2472_v2  }
  0x59   : > { %2090 = vset.pattern.permute.xlu1 %v2275_v13 }
  0x5a   : > { %530 = vperm.xlu1 %2090, %v2472_v2  }
  0x5c   : > { %2095 = vset.pattern.permute.xlu0 %v2276_v14 }
  0x5d   : > { %637 = vperm.xlu0 %2095, %v2472_v2  }
  0x5e   : > { %495 = vrot.lane.b32.xlu1 %v2477_v3, %s2277_s17 }
  0x5f   : > { %2093 = vset.pattern.permute.xlu1 %v2278_v15 }
  0x61   : > { %2096 = vset.pattern.permute.xlu0 %v2279_v16 }
  0x62   : > { %497 = vrot.lane.b32.xlu1 %v2484_v5, %s2277_s17  ;;  %653 = vperm.xlu0 %2096, %v2472_v2  }
  0x66   : > { %578 = vperm.xlu1 %2093, %v2472_v2   ;;  %2099 = vset.pattern.permute.xlu0 %v2280_v17 }
  0x67   : > { %711 = vperm.xlu0 %2099, %v2472_v2  }
  0x6a   : > { %2094 = vset.pattern.permute.xlu1 %v2281_v18 }
  0x6b   : > { %621 = vperm.xlu1 %2094, %v2472_v2   ;;  %2102 = vset.pattern.permute.xlu0 %v2282_v19 }
  0x6c   : > { %816 = vperm.xlu0 %2102, %v2472_v2  }
  0x6f   : > { %593 = vrot.lane.b32.xlu1 %v2477_v3, %s2283_s18 }
  0x70   : > { %2097 = vset.pattern.permute.xlu1 %v2284_v20  ;;  %790 = vrot.lane.b32.xlu0 %v2484_v5, %s2285_s15 }
  0x71   : > { %2105 = vset.pattern.permute.xlu0 %v2286_v21 }
  0x73   : > { %595 = vrot.lane.b32.xlu1 %v2484_v5, %s2283_s18 }
  0x74   : > { %864 = vperm.xlu0 %2105, %v2472_v2  }
  0x77   : > { %669 = vperm.xlu1 %2097, %v2472_v2  }
  0x78   : > { %879 = vrot.lane.b32.xlu0 %v2477_v3, %s2287_s19 }
  0x79   : > { %2108 = vset.pattern.permute.xlu0 %v2288_v22 }
  0x7b   : > { %2098 = vset.pattern.permute.xlu1 %v2289_v23 }
  0x7c   : > { %685 = vperm.xlu1 %2098, %v2472_v2   ;;  %941 = vperm.xlu0 %2108, %v2472_v2  }
  0x80   : > { %2100 = vset.pattern.permute.xlu1 %v2290_v24  ;;  %2111 = vset.pattern.permute.xlu0 %v2291_v25 }
  0x81   : > { %737 = vperm.xlu1 %2100, %v2472_v2   ;;  %1016 = vperm.xlu0 %2111, %v2472_v2  }
  0x85   : > { %2101 = vset.pattern.permute.xlu1 %v2292_v26  ;;  %2112 = vset.pattern.permute.xlu0 %v2293_v27 }
  0x86   : > { %763 = vperm.xlu1 %2101, %v2472_v2   ;;  %1032 = vperm.xlu0 %2112, %v2472_v2  }
  0x8a   : > { %2103 = vset.pattern.permute.xlu1 %v2294_v28  ;;  %2115 = vset.pattern.permute.xlu0 %v2295_v29 }
  0x8b   : > { %832 = vperm.xlu1 %2103, %v2472_v2   ;;  %1109 = vperm.xlu0 %2115, %v2472_v2  }
  0x8f   : > { %788 = vrot.lane.b32.xlu1 %v2477_v3, %s2285_s15  ;;  %2116 = vset.pattern.permute.xlu0 %v2296_v30 }
  0x90   : > { %2104 = vset.pattern.permute.xlu1 %v2297_v31  ;;  %1125 = vperm.xlu0 %2116, %v2472_v2  }
  0x93   : > { %848 = vperm.xlu1 %2104, %v2472_v2  }
  0x94   : > { %2119 = vset.pattern.permute.xlu0 %v2264_v1 }
  0x95   : > { %1176 = vperm.xlu0 %2119, %v2561_v32  }
  0x97   : > { %2106 = vset.pattern.permute.xlu1 %v2298_v33 }
  0x98   : > { %909 = vperm.xlu1 %2106, %v2472_v2  }
  0x99   : > { %2122 = vset.pattern.permute.xlu0 %v2268_v7  ;;  %v414_v7 = vrot.slane %v2600_v39, %v2624_v46 }
  0x9a   : > { %1224 = vperm.xlu0 %2122, %v2561_v32  }
  0x9c   : > { %2107 = vset.pattern.permute.xlu1 %v2299_v34 }
  0x9d   : > { %925 = vperm.xlu1 %2107, %v2472_v2  }
  0x9e   : > { %2125 = vset.pattern.permute.xlu0 %v2270_v8  ;;  %v418_v8 = vrot.slane %v2600_v39, %v2629_v48 }
  0x9f   : > { %1280 = vperm.xlu0 %2125, %v2561_v32  }
  0xa0   : > { %v2686_v49 = vrot.slane %v418_v8, %v2624_v46 }
  0xa1   : > { %881 = vrot.lane.b32.xlu1 %v2484_v5, %s2287_s19 }
  0xa2   : > { %2109 = vset.pattern.permute.xlu1 %v3373_v35  ;;  %vm428_vm10 = vcmp.eq.s32.totalorder %v2686_v49, 1 }
  0xa3   : > { %2128 = vset.pattern.permute.xlu0 %v2273_v11  ;;  %v2672_v11 = vsub.s32 1, %v2613_v44 }
  0xa4   : > { %1336 = vperm.xlu0 %2128, %v2561_v32  }
  0xa5   : > { %957 = vperm.xlu1 %2109, %v2472_v2  }
  0xa8   : > { %2129 = vset.pattern.permute.xlu0 %v2274_v12 }
  0xa9   : > { %2110 = vset.pattern.permute.xlu1 %v3372_v36  ;;  %1352 = vperm.xlu0 %2129, %v2561_v32  }
  0xaa   : > { %1000 = vperm.xlu1 %2110, %v2472_v2  }
  0xad   : > { %2132 = vset.pattern.permute.xlu0 %v2276_v14 }
  0xae   : > { %972 = vrot.lane.b32.xlu1 %v2477_v3, %s2302_s22  ;;  %1408 = vperm.xlu0 %2132, %v2561_v32  }
  0xaf   : > { %2113 = vset.pattern.permute.xlu1 %v3371_v38 }
  0xb2   : > { %974 = vrot.lane.b32.xlu1 %v2484_v5, %s2302_s22  ;;  %2133 = vset.pattern.permute.xlu0 %v2279_v16  ;;  %v1981_v16 = vrot.slane %v2663_v63, 9 }
  0xb3   : > { %1424 = vperm.xlu0 %2133, %v2561_v32  }
  0xb4   : > { %vm2691_vm7 = vcmp.ne.s32.totalorder %v1981_v16, 0 }
  0xb5   : > { %vm507_vm11 = vmand %vm312_vm0, %vm2691_vm7 }
  0xb6   : > { %1048 = vperm.xlu1 %2113, %v2472_v2  }
  0xb7   : > { %2136 = vset.pattern.permute.xlu0 %v2280_v17 }
  0xb8   : > { %1472 = vperm.xlu0 %2136, %v2561_v32  }
  0xba   : > { %2114 = vset.pattern.permute.xlu1 %v3370_v43 }
  0xbb   : > { %v2615_v45 = vpop.permute.xlu1 %373  ;;  %1093 = vperm.xlu1 %2114, %v2472_v2   ;;  %v342_v52 = vpop.permute.xlu0 %341 }
  0xbc   : > { %2139 = vset.pattern.permute.xlu0 %v2282_v19 }
  0xbf   : > { %v304_v47 = vpop.permute.xlu1 %303  ;;  %1063 = vrot.lane.b32.xlu1 %v2477_v3, %s2305_s21 }
  0xc0   : > { %2117 = vset.pattern.permute.xlu1 %v3369_v50  ;;  %v358_v59 = vpop.permute.xlu0 %357  ;;  %v508_v50 = vsel %vm507_vm11, 1, %v2264_v1  ;;  %vm792_vm11 = vcmp.lt.s32.totalorder %v2637_v55, 127 }
  0xc1   : > { %v512_v36 = vrot.slane %v508_v50, %v2624_v46 }
  0xc3   : > { %1065 = vrot.lane.b32.xlu1 %v2484_v5, %s2305_s21  ;;  %v306_v53 = vpop.permute.xlu1 %305 }
  0xc4   : > { %v310_v61 = vsel %vm309_vm3, %v304_v47, %v306_v53  ;;  %v311_v62 = vsel %vm309_vm3, %v306_v53, %v304_v47  ;;  %v2683_v47 = vrot.slane %v414_v7, %v2624_v46 }
  0xc5   : > { %v337_v12 = vsel %vm335_vm5, %v311_v62, 0.0  ;;  %v338_v14 = vsel %vm336_vm6, %v310_v61, 0.0  ;;  %v390_v17 = vpop.permute.xlu0 %389 }
  0xc6   : > { %v347_v40 = vrot.slane %v337_v12, %v2624_v46  ;;  %v351_v41 = vrot.slane %v338_v14, %v2624_v46  ;;  %v363_v51 = vrot.slane %v337_v12, %v2672_v11  ;;  %v367_v53 = vrot.slane %v338_v14, %v2672_v11 }
  0xc7   : > { %1141 = vperm.xlu1 %2117, %v2472_v2   ;;  %v2646_v58 = vpop.permute.xlu1 %432  ;;  %vm427_vm9 = vcmp.eq.s32.totalorder %v2683_v47, 1 }
  0xc8   : > { %v352_v61 = vmul.f32 %v347_v40, %v342_v52  ;;  %v353_v62 = vmul.f32 %v351_v41, %v342_v52  ;;  %v368_v7 = vmul.f32 %v363_v51, %v358_v59  ;;  %v369_v8 = vmul.f32 %v367_v53, %v358_v59 }
  0xc9   : > { %v2711_v52 = vsub.s32 3, %v2613_v44  ;;  %v383_v41 = vrot.slane %v338_v14, %v2629_v48 }
  0xca   : > { %v370_v53 = vadd.f32 %v368_v7, %v352_v61 }
  0xcb   : > { %2118 = vset.pattern.permute.xlu1 %v2264_v1  ;;  %v395_v43 = vrot.slane %v337_v12, %v2711_v52  ;;  %v399_v38 = vrot.slane %v338_v14, %v2711_v52  ;;  %v2740_v14 = vrot.slane %v512_v36, %v2624_v46 }
  0xcc   : > { %1158 = vperm.xlu1 %2118, %v299_v60   ;;  %v2665_v2 = vpop.permute.xlu1 %448 }
  0xcd   : > { %vm525_vm13 = vcmp.eq.s32.totalorder %v2740_v14, 1 }
  0xd0   : > { %2120 = vset.pattern.permute.xlu1 %v2266_v4  ;;  %v407_v19 = vpop.permute.xlu1 %406  ;;  %v405_v4 = vpop.permute.xlu0 %404 }
  0xd1   : > { %1192 = vperm.xlu1 %2120, %v2561_v32   ;;  %v409_v16 = vsel %vm408_vm8, %v405_v4, %v407_v19  ;;  %v410_v40 = vsel %vm408_vm8, %v407_v19, %v405_v4  ;;  %v371_v4 = vadd.f32 %v369_v8, %v353_v62  ;;  %v400_v8 = vmul.f32 %v395_v43, %v390_v17 }
  0xd2   : > { %v2718_v59 = vsel %vm427_vm9, %v410_v40, 0.0  ;;  %v2722_v51 = vsel %vm428_vm10, %v409_v16, 0.0  ;;  %v516_v40 = vrot.slane %v508_v50, %v2629_v48  ;;  %v385_v16 = vmul.f32 %v383_v41, %v2615_v45 }
  0xd3   : > { %v438_v61 = vrot.slane %v2718_v59, %v2624_v46  ;;  %v458_v36 = vrot.slane %v2722_v51, %v2672_v11 }
  0xd4   : > { %v2696_v60 = vpop.permute.xlu1 %480  ;;  %v387_v7 = vadd.f32 %v385_v16, %v371_v4  ;;  %v2743_v50 = vrot.slane %v516_v40, %v2624_v46 }
  0xd5   : > { %2121 = vset.pattern.permute.xlu1 %v2263_v0  ;;  %v379_v0 = vrot.slane %v337_v12, %v2629_v48 }
  0xd6   : > { %1208 = vperm.xlu1 %2121, %v2561_v32   ;;  %vm526_vm14 = vcmp.eq.s32.totalorder %v2743_v50, 1 }
  0xd7   : > { %v384_v35 = vmul.f32 %v379_v0, %v2615_v45  ;;  %v401_v0 = vmul.f32 %v399_v38, %v390_v17  ;;  %v443_v45 = vmul.f32 %v438_v61, %v2646_v58  ;;  %v460_v61 = vmul.f32 %v458_v36, %v2665_v2 }
  0xd9   : > { %v2724_v19 = vpop.permute.xlu1 %530  ;;  %v386_v12 = vadd.f32 %v384_v35, %v370_v53  ;;  %v403_v4 = vadd.f32 %v401_v0, %v387_v7  ;;  %v465_v7 = vpop.permute.xlu0 %464 }
  0xda   : > { %2123 = vset.pattern.permute.xlu1 %v2267_v6  ;;  %v442_v6 = vrot.slane %v2722_v51, %v2624_v46 }
  0xdb   : > { %1248 = vperm.xlu1 %2123, %v2561_v32   ;;  %v402_v53 = vadd.f32 %v400_v8, %v386_v12  ;;  %v474_v12 = vrot.slane %v2722_v51, %v2629_v48 }
  0xdc   : > { %v444_v41 = vmul.f32 %v442_v6, %v2646_v58  ;;  %v470_v6 = vrot.slane %v2718_v59, %v2629_v48 }
  0xdd   : > { %v496_v62 = vpop.permute.xlu1 %495  ;;  %v445_v38 = vadd.f32 %v443_v45, %v402_v53  ;;  %v490_v45 = vrot.slane %v2722_v51, %v2711_v52 }
  0xde   : > { %v446_v43 = vadd.f32 %v444_v41, %v403_v4  ;;  %v603_v41 = vrot.slane %v2600_v39, %v2672_v11  ;;  %v475_v53 = vmul.f32 %v470_v6, %v465_v7  ;;  %v476_v4 = vmul.f32 %v474_v12, %v465_v7  ;;  %v547_v6 = vpop.permute.xlu0 %546 }
  0xdf   : > { %2124 = vset.pattern.permute.xlu1 %v2271_v9  ;;  %v454_v9 = vrot.slane %v2718_v59, %v2672_v11 }
  0xe0   : > { %1264 = vperm.xlu1 %2124, %v2561_v32   ;;  %v462_v0 = vadd.f32 %v460_v61, %v446_v43 }
  0xe1   : > { %v498_v35 = vpop.permute.xlu1 %497  ;;  %v459_v16 = vmul.f32 %v454_v9, %v2665_v2  ;;  %v486_v2 = vrot.slane %v2718_v59, %v2711_v52 }
  0xe2   : > { %v500_v58 = vsel %vm499_vm12, %v496_v62, %v498_v35  ;;  %v501_v17 = vsel %vm499_vm12, %v498_v35, %v496_v62  ;;  %v607_v35 = vrot.slane %v2600_v39, %v2711_v52 }
  0xe3   : > { %v2771_v62 = vsel %vm525_vm13, %v501_v17, 0.0  ;;  %v461_v8 = vadd.f32 %v459_v16, %v445_v38  ;;  %v478_v38 = vadd.f32 %v476_v4, %v462_v0  ;;  %v491_v39 = vmul.f32 %v486_v2, %v2696_v60 }
  0xe4   : > { %2126 = vset.pattern.permute.xlu1 %v2272_v10  ;;  %v2775_v10 = vsel %vm526_vm14, %v500_v58, 0.0  ;;  %v536_v9 = vrot.slane %v2771_v62, %v2624_v46  ;;  %v2795_v43 = vrot.slane %v607_v35, %v2672_v11  ;;  %v492_v58 = vmul.f32 %v490_v45, %v2696_v60 }
  0xe5   : > { %1296 = vperm.xlu1 %2126, %v2561_v32   ;;  %v2761_v40 = vpop.permute.xlu1 %578  ;;  %v540_v36 = vrot.slane %v2775_v10, %v2624_v46  ;;  %v477_v51 = vadd.f32 %v475_v53, %v461_v8  ;;  %v552_v8 = vrot.slane %v2771_v62, %v2672_v11  ;;  %v556_v60 = vrot.slane %v2775_v10, %v2672_v11 }
  0xe6   : > { %v541_v17 = vmul.f32 %v536_v9, %v2724_v19  ;;  %v494_v7 = vadd.f32 %v492_v58, %v478_v38  ;;  %vm3374_vm2 = vcmp.eq.s32.totalorder %v2795_v43, 1  ;;  %v568_v53 = vrot.slane %v2771_v62, %v2629_v48  ;;  %v563_v9 = vpop.permute.xlu0 %562 }
  0xe7   : > { %v542_v16 = vmul.f32 %v540_v36, %v2724_v19  ;;  %v493_v12 = vadd.f32 %v491_v39, %v477_v51  ;;  %v558_v35 = vmul.f32 %v556_v60, %v547_v6  ;;  %v572_v4 = vrot.slane %v2775_v10, %v2629_v48 }
  0xe8   : > { %v584_v58 = vrot.slane %v2771_v62, %v2711_v52 }
  0xe9   : > { %2127 = vset.pattern.permute.xlu1 %v2275_v13  ;;  %v2792_v13 = vrot.slane %v603_v41, %v2672_v11  ;;  %v543_v0 = vadd.f32 %v541_v17, %v493_v12  ;;  %v544_v2 = vadd.f32 %v542_v16, %v494_v7  ;;  %v557_v41 = vmul.f32 %v552_v8, %v547_v6 }
  0xea   : > { %1320 = vperm.xlu1 %2127, %v2561_v32   ;;  %v622_v59 = vpop.permute.xlu1 %621  ;;  %v588_v17 = vrot.slane %v2775_v10, %v2711_v52  ;;  %v573_v16 = vmul.f32 %v568_v53, %v563_v9  ;;  %v638_v7 = vpop.permute.xlu0 %637 }
  0xeb   : > { %vm3375_vm0 = vcmp.eq.s32.totalorder %v2792_v13, 1  ;;  %v559_v38 = vadd.f32 %v557_v41, %v543_v0  ;;  %v560_v39 = vadd.f32 %v558_v35, %v544_v2  ;;  %v589_v2 = vmul.f32 %v584_v58, %v2761_v40 }
  0xec   : > { %v590_v62 = vmul.f32 %v588_v17, %v2761_v40  ;;  %v720_v58 = vsub.s32 5, %v2613_v44 }
  0xed   : > { %v575_v8 = vadd.f32 %v573_v16, %v559_v38  ;;  %v694_v38 = vsub.s32 4, %v2613_v44 }
  0xee   : > { %2130 = vset.pattern.permute.xlu1 %v2278_v15  ;;  %v594_v61 = vpop.permute.xlu1 %593  ;;  %v654_v35 = vpop.permute.xlu0 %653 }
  0xef   : > { %1368 = vperm.xlu1 %2130, %v2561_v32  }
  0xf2   : > { %v596_v45 = vpop.permute.xlu1 %595  ;;  %v712_v17 = vpop.permute.xlu0 %711 }
  0xf3   : > { %v598_v15 = vsel %vm3376_vm15, %v594_v61, %v596_v45  ;;  %v599_v19 = vsel %vm3376_vm15, %v596_v45, %v594_v61  ;;  %2131 = vset.pattern.permute.xlu1 %v2281_v18  ;;  %v574_v61 = vmul.f32 %v572_v4, %v563_v9  ;;  %vm886_vm15 = vmand %vm502_vm4, %vm2608_vm1  ;;  %vm3380_vm1 = vcmp.lt.s32.totalorder %v2637_v55, 113 }
  0xf4   : > { %1392 = vperm.xlu1 %2131, %v2561_v32   ;;  %v618_v36 = vsel %vm3375_vm0, %v599_v19, 0.0  ;;  %v619_v51 = vsel %vm3374_vm2, %v598_v15, 0.0  ;;  %v591_v15 = vadd.f32 %v589_v2, %v575_v8 }
  0xf5   : > { %v627_v6 = vrot.slane %v618_v36, %v2624_v46  ;;  %v631_v12 = vrot.slane %v619_v51, %v2624_v46  ;;  %v576_v60 = vadd.f32 %v574_v61, %v560_v39  ;;  %v643_v41 = vrot.slane %v618_v36, %v2672_v11 }
  0xf6   : > { %v670_v18 = vpop.permute.xlu1 %669  ;;  %v675_v2 = vrot.slane %v618_v36, %v2711_v52 }
  0xf7   : > { %v632_v45 = vmul.f32 %v627_v6, %v622_v59  ;;  %v633_v10 = vmul.f32 %v631_v12, %v622_v59  ;;  %v592_v19 = vadd.f32 %v590_v62, %v576_v60  ;;  %v648_v40 = vmul.f32 %v643_v41, %v638_v7 }
  0xf8   : > { %2134 = vset.pattern.permute.xlu1 %v2284_v20  ;;  %v647_v20 = vrot.slane %v619_v51, %v2672_v11  ;;  %v659_v59 = vrot.slane %v618_v36, %v2629_v48  ;;  %v691_v6 = vrot.slane %v2477_v3, %v2624_v46  ;;  %v695_v12 = vrot.slane %v2477_v3, %v694_v38 }
  0xf9   : > { %1440 = vperm.xlu1 %2134, %v2561_v32   ;;  %v634_v53 = vadd.f32 %v632_v45, %v591_v15  ;;  %v635_v4 = vadd.f32 %v633_v10, %v592_v19  ;;  %v717_v62 = vrot.slane %v2477_v3, %v2672_v11  ;;  %v721_v45 = vrot.slane %v2477_v3, %v720_v58  ;;  %v817_v10 = vpop.permute.xlu0 %816 }
  0xfa   : > { %v649_v39 = vmul.f32 %v647_v20, %v638_v7  ;;  %v664_v7 = vmul.f32 %v659_v59, %v654_v35  ;;  %v798_v15 = vrot.slane %v2663_v63, %v2672_v11  ;;  %v802_v19 = vrot.slane %v2663_v63, %v2711_v52 }
  0xfb   : > { %v686_v0 = vpop.permute.xlu1 %685  ;;  %v650_v16 = vadd.f32 %v648_v40, %v634_v53  ;;  %v701_v36 = vrot.slane %v691_v6, %v2624_v46  ;;  %v727_v40 = vrot.slane %v717_v62, %v2672_v11 }
  0xfc   : > { %v651_v61 = vadd.f32 %v649_v39, %v635_v4  ;;  %v705_v4 = vrot.slane %v695_v12, %v2624_v46  ;;  %v731_v39 = vrot.slane %v721_v45, %v2672_v11  ;;  %v2871_v59 = vrot.slane %v798_v15, %v2672_v11 }
  0xfd   : > { %2135 = vset.pattern.permute.xlu1 %v2289_v23  ;;  %v663_v23 = vrot.slane %v619_v51, %v2629_v48  ;;  %v666_v41 = vadd.f32 %v664_v7, %v650_v16  ;;  %v706_v6 = vmul.f32 %v701_v36, %v686_v0  ;;  %v769_v7 = vrot.slane %v2477_v3, %v2711_v52 }
  0xfe   : > { %1456 = vperm.xlu1 %2135, %v2561_v32   ;;  %v707_v12 = vmul.f32 %v705_v4, %v686_v0  ;;  %v733_v62 = vmul.f32 %v731_v39, %v712_v17  ;;  %vm3381_vm2 = vcmp.eq.s32.totalorder %v2871_v59, 1 }
  0xff   : > { %v665_v60 = vmul.f32 %v663_v23, %v654_v35  ;;  %v680_v35 = vmul.f32 %v675_v2, %v670_v18  ;;  %v2874_v23 = vrot.slane %v802_v19, %v2672_v11 }
 0x100   : > { %v2838_v9 = vpop.permute.xlu1 %737 }
 0x101   : > { %v667_v20 = vadd.f32 %v665_v60, %v651_v61  ;;  %v682_v58 = vadd.f32 %v680_v35, %v666_v41  ;;  %v791_v61 = vpop.permute.xlu0 %790  ;;  %vm3377_vm0 = vcmp.eq.s32.totalorder %v2874_v23, 1  ;;  %v779_v41 = vrot.slane %v769_v7, %v2711_v52 }
 0x102   : > { %2137 = vset.pattern.permute.xlu1 %v2290_v24  ;;  %v679_v24 = vrot.slane %v619_v51, %v2711_v52  ;;  %v746_v51 = vsub.s32 6, %v2613_v44 }
 0x103   : > { %1488 = vperm.xlu1 %2137, %v2561_v32  }
 0x104   : > { %v681_v53 = vmul.f32 %v679_v24, %v670_v18  ;;  %v743_v18 = vrot.slane %v2477_v3, %v2629_v48  ;;  %v732_v24 = vmul.f32 %v727_v40, %v712_v17 }
 0x105   : > { %v2849_v8 = vpop.permute.xlu1 %763 }
 0x106   : > { %v683_v16 = vadd.f32 %v681_v53, %v667_v20  ;;  %v887_v53 = vsel %vm886_vm15, 1, %v2264_v1 }
 0x107   : > { %2138 = vset.pattern.permute.xlu1 %v2292_v26  ;;  %v772_v26 = vsub.s32 7, %v2613_v44  ;;  %v747_v44 = vrot.slane %v2477_v3, %v746_v51 }
 0x108   : > { %1504 = vperm.xlu1 %2138, %v2561_v32   ;;  %v709_v45 = vadd.f32 %v707_v12, %v683_v16  ;;  %v891_v16 = vrot.slane %v887_v53, %v2624_v46 }
 0x109   : > { %v773_v60 = vrot.slane %v2477_v3, %v772_v26  ;;  %v753_v3 = vrot.slane %v743_v18, %v2629_v48  ;;  %v757_v17 = vrot.slane %v747_v44, %v2629_v48  ;;  %v895_v18 = vrot.slane %v887_v53, %v2629_v48 }
 0x10a   : > { %v2866_v38 = vpop.permute.xlu1 %832  ;;  %v735_v35 = vadd.f32 %v733_v62, %v709_v45 }
 0x10b   : > { %v783_v42 = vrot.slane %v773_v60, %v2711_v52  ;;  %v758_v4 = vmul.f32 %v753_v3, %v2838_v9  ;;  %v759_v26 = vmul.f32 %v757_v17, %v2838_v9  ;;  %v2912_v9 = vrot.slane %v891_v16, %v2624_v46 }
 0x10c   : > { %2140 = vset.pattern.permute.xlu1 %v2294_v28  ;;  %v708_v28 = vadd.f32 %v706_v6, %v682_v58  ;;  %v784_v6 = vmul.f32 %v779_v41, %v2849_v8 }
 0x10d   : > { %v785_v12 = vmul.f32 %v783_v42, %v2849_v8  ;;  %vm3379_vm15 = vcmp.eq.s32.totalorder %v2912_v9, 1 }
 0x10e   : > { %v789_v2 = vpop.permute.xlu1 %788  ;;  %v734_v51 = vadd.f32 %v732_v24, %v708_v28  ;;  %v2915_v24 = vrot.slane %v895_v18, %v2624_v46 }
 0x10f   : > { %v793_v15 = vsel %vm792_vm11, %v789_v2, %v791_v61  ;;  %v794_v0 = vsel %vm792_vm11, %v791_v61, %v789_v2  ;;  %v761_v61 = vadd.f32 %v759_v26, %v735_v35  ;;  %v865_v2 = vpop.permute.xlu0 %864 }
 0x110   : > { %v813_v20 = vsel %vm3381_vm2, %v793_v15, 0.0  ;;  %v814_v36 = vsel %vm3377_vm0, %v794_v0, 0.0  ;;  %v760_v44 = vadd.f32 %v758_v4, %v734_v51  ;;  %vm3378_vm0 = vcmp.eq.s32.totalorder %v2915_v24, 1  ;;  %vm1070_vm2 = vmand %vm502_vm4, %vm2691_vm7 }
 0x111   : > { %v822_v40 = vrot.slane %v813_v20, %v2624_v46  ;;  %v826_v39 = vrot.slane %v814_v36, %v2624_v46  ;;  %v787_v28 = vadd.f32 %v785_v12, %v761_v61  ;;  %v838_v45 = vrot.slane %v813_v20, %v2672_v11 }
 0x112   : > { %v849_v19 = vpop.permute.xlu1 %848  ;;  %v786_v62 = vadd.f32 %v784_v6, %v760_v44  ;;  %v842_v15 = vrot.slane %v814_v36, %v2672_v11  ;;  %v854_v51 = vrot.slane %v813_v20, %v2629_v48  ;;  %v858_v35 = vrot.slane %v814_v36, %v2629_v48 }
 0x113   : > { %v827_v7 = vmul.f32 %v822_v40, %v817_v10  ;;  %v828_v60 = vmul.f32 %v826_v39, %v817_v10  ;;  %v880_v41 = vpop.permute.xlu0 %879  ;;  %v843_v8 = vmul.f32 %v838_v45, %v2866_v38  ;;  %v874_v18 = vrot.slane %v814_v36, %v2711_v52 }
 0x114   : > { %v844_v10 = vmul.f32 %v842_v15, %v2866_v38  ;;  %v870_v38 = vrot.slane %v813_v20, %v2711_v52  ;;  %v859_v44 = vmul.f32 %v854_v51, %v849_v19  ;;  %v860_v61 = vmul.f32 %v858_v35, %v849_v19 }
 0x115   : > { %v829_v3 = vadd.f32 %v827_v7, %v786_v62  ;;  %v830_v17 = vadd.f32 %v828_v60, %v787_v28  ;;  %v982_v28 = vrot.slane %v2663_v63, %v2624_v46  ;;  %v986_v45 = vrot.slane %v2663_v63, %v2629_v48 }
 0x116   : > { %v875_v15 = vmul.f32 %v870_v38, %v865_v2  ;;  %vm1067_vm4 = vcmp.lt.s32.totalorder %v2637_v55, 111 }
 0x117   : > { %v910_v58 = vpop.permute.xlu1 %909  ;;  %v845_v26 = vadd.f32 %v843_v8, %v829_v3  ;;  %v846_v40 = vadd.f32 %v844_v10, %v830_v17  ;;  %v876_v3 = vmul.f32 %v874_v18, %v865_v2 }
 0x119   : > { %v861_v60 = vadd.f32 %v859_v44, %v845_v26  ;;  %v862_v62 = vadd.f32 %v860_v61, %v846_v40  ;;  %v942_v40 = vpop.permute.xlu0 %941 }
 0x11b   : > { %v878_v19 = vadd.f32 %v876_v3, %v862_v62 }
 0x11c   : > { %v926_v0 = vpop.permute.xlu1 %925 }
 0x120   : > { %v882_v42 = vpop.permute.xlu1 %881 }
 0x121   : > { %v884_v53 = vsel %vm3380_vm1, %v880_v41, %v882_v42  ;;  %v885_v4 = vsel %vm3380_vm1, %v882_v42, %v880_v41  ;;  %v877_v41 = vadd.f32 %v875_v15, %v861_v60  ;;  %v2945_v42 = vrot.slane %v982_v28, %v2624_v46 }
 0x122   : > { %v906_v39 = vsel %vm3379_vm15, %v884_v53, 0.0  ;;  %v907_v16 = vsel %vm3378_vm0, %v885_v4, 0.0  ;;  %v2948_v53 = vrot.slane %v986_v45, %v2624_v46  ;;  %vm976_vm0 = vcmp.lt.s32.totalorder %v2637_v55, 112 }
 0x123   : > { %v915_v6 = vrot.slane %v906_v39, %v2624_v46  ;;  %v919_v12 = vrot.slane %v907_v16, %v2624_v46  ;;  %v931_v8 = vrot.slane %v906_v39, %v2672_v11  ;;  %v935_v10 = vrot.slane %v907_v16, %v2672_v11 }
 0x124   : > { %v958_v7 = vpop.permute.xlu1 %957  ;;  %v951_v26 = vrot.slane %v907_v16, %v2629_v48  ;;  %vm995_vm15 = vcmp.eq.s32.totalorder %v2945_v42, 1  ;;  %vm996_vm1 = vcmp.eq.s32.totalorder %v2948_v53, 1  ;;  %v963_v44 = vrot.slane %v906_v39, %v2711_v52 }
 0x125   : > { %v920_v20 = vmul.f32 %v915_v6, %v910_v58  ;;  %v921_v17 = vmul.f32 %v919_v12, %v910_v58  ;;  %v936_v4 = vmul.f32 %v931_v8, %v926_v0  ;;  %v937_v2 = vmul.f32 %v935_v10, %v926_v0 }
 0x126   : > { %v947_v58 = vrot.slane %v906_v39, %v2629_v48  ;;  %v967_v61 = vrot.slane %v907_v16, %v2711_v52  ;;  %v953_v0 = vmul.f32 %v951_v26, %v942_v40 }
 0x127   : > { %v922_v51 = vadd.f32 %v920_v20, %v877_v41  ;;  %v923_v35 = vadd.f32 %v921_v17, %v878_v19  ;;  %v1071_v17 = vsel %vm1070_vm2, 1, %v2264_v1  ;;  %v968_v41 = vmul.f32 %v963_v44, %v958_v7 }
 0x128   : > { %v952_v12 = vmul.f32 %v947_v58, %v942_v40  ;;  %v969_v54 = vmul.f32 %v967_v61, %v958_v7 }
 0x129   : > { %v1001_v36 = vpop.permute.xlu1 %1000  ;;  %v938_v38 = vadd.f32 %v936_v4, %v922_v51  ;;  %v939_v18 = vadd.f32 %v937_v2, %v923_v35  ;;  %v1017_v51 = vpop.permute.xlu0 %1016  ;;  %v1075_v4 = vrot.slane %v1071_v17, %v2624_v46  ;;  %v1079_v2 = vrot.slane %v1071_v17, %v2629_v48 }
 0x12b   : > { %v954_v16 = vadd.f32 %v952_v12, %v938_v38  ;;  %v955_v45 = vadd.f32 %v953_v0, %v939_v18  ;;  %v2979_v44 = vrot.slane %v1075_v4, %v2624_v46  ;;  %v2982_v61 = vrot.slane %v1079_v2, %v2624_v46 }
 0x12d   : > { %v973_v63 = vpop.permute.xlu1 %972  ;;  %v970_v8 = vadd.f32 %v968_v41, %v954_v16  ;;  %v971_v10 = vadd.f32 %v969_v54, %v955_v45  ;;  %vm1088_vm7 = vcmp.eq.s32.totalorder %v2979_v44, 1  ;;  %vm1089_vm2 = vcmp.eq.s32.totalorder %v2982_v61, 1 }
 0x131   : > { %v975_v6 = vpop.permute.xlu1 %974 }
 0x132   : > { %v977_v60 = vsel %vm976_vm0, %v973_v63, %v975_v6  ;;  %v978_v62 = vsel %vm976_vm0, %v975_v6, %v973_v63  ;;  %v1033_v6 = vpop.permute.xlu0 %1032 }
 0x133   : > { %v997_v28 = vsel %vm995_vm15, %v977_v60, 0.0  ;;  %v998_v39 = vsel %vm996_vm1, %v978_v62, 0.0 }
 0x134   : > { %v1006_v15 = vrot.slane %v997_v28, %v2624_v46  ;;  %v1010_v3 = vrot.slane %v998_v39, %v2624_v46  ;;  %v1022_v35 = vrot.slane %v997_v28, %v2672_v11  ;;  %v1026_v63 = vrot.slane %v998_v39, %v2672_v11 }
 0x135   : > { %v1049_v20 = vpop.permute.xlu1 %1048  ;;  %v1038_v7 = vrot.slane %v997_v28, %v2629_v48  ;;  %v1054_v45 = vrot.slane %v997_v28, %v2711_v52 }
 0x136   : > { %v1011_v19 = vmul.f32 %v1006_v15, %v1001_v36  ;;  %v1012_v37 = vmul.f32 %v1010_v3, %v1001_v36  ;;  %v1027_v38 = vmul.f32 %v1022_v35, %v1017_v51  ;;  %v1028_v18 = vmul.f32 %v1026_v63, %v1017_v51 }
 0x137   : > { %v1042_v36 = vrot.slane %v998_v39, %v2629_v48  ;;  %v1043_v62 = vmul.f32 %v1038_v7, %v1033_v6  ;;  %v1058_v15 = vrot.slane %v998_v39, %v2711_v52 }
 0x138   : > { %v1013_v58 = vadd.f32 %v1011_v19, %v970_v8  ;;  %v1014_v26 = vadd.f32 %v1012_v37, %v971_v10  ;;  %v1110_v37 = vpop.permute.xlu0 %1109  ;;  %v1059_v8 = vmul.f32 %v1054_v45, %v1049_v20 }
 0x139   : > { %v1044_v16 = vmul.f32 %v1042_v36, %v1033_v6  ;;  %v1060_v10 = vmul.f32 %v1058_v15, %v1049_v20 }
 0x13a   : > { %v1094_v40 = vpop.permute.xlu1 %1093  ;;  %v1029_v12 = vadd.f32 %v1027_v38, %v1013_v58  ;;  %v1030_v0 = vadd.f32 %v1028_v18, %v1014_v26 }
 0x13c   : > { %v1045_v3 = vadd.f32 %v1043_v62, %v1029_v12  ;;  %v1046_v17 = vadd.f32 %v1044_v16, %v1030_v0  ;;  %v1126_v62 = vpop.permute.xlu0 %1125 }
 0x13e   : > { %v1064_v60 = vpop.permute.xlu1 %1063  ;;  %v1061_v2 = vadd.f32 %v1059_v8, %v1045_v3  ;;  %v1062_v58 = vadd.f32 %v1060_v10, %v1046_v17 }
 0x142   : > { %v1066_v41 = vpop.permute.xlu1 %1065 }
 0x143   : > { %v1068_v54 = vsel %vm1067_vm4, %v1064_v60, %v1066_v41  ;;  %v1069_v19 = vsel %vm1067_vm4, %v1066_v41, %v1064_v60 }
 0x144   : > { %v1090_v28 = vsel %vm1088_vm7, %v1068_v54, 0.0  ;;  %v1091_v39 = vsel %vm1089_vm2, %v1069_v19, 0.0 }
 0x145   : > { %v1099_v51 = vrot.slane %v1090_v28, %v2624_v46  ;;  %v1103_v35 = vrot.slane %v1091_v39, %v2624_v46  ;;  %v1115_v63 = vrot.slane %v1090_v28, %v2672_v11  ;;  %v1119_v4 = vrot.slane %v1091_v39, %v2672_v11 }
 0x146   : > { %v1131_v20 = vrot.slane %v1090_v28, %v2629_v48  ;;  %v1135_v18 = vrot.slane %v1091_v39, %v2629_v48  ;;  %v1147_v7 = vrot.slane %v1090_v28, %v2711_v52  ;;  %v1151_v36 = vrot.slane %v1091_v39, %v2711_v52  ;;  %v1142_v16 = vpop.permute.xlu1 %1141 }
 0x147   : > { %v1104_v26 = vmul.f32 %v1099_v51, %v1094_v40  ;;  %v1105_v38 = vmul.f32 %v1103_v35, %v1094_v40  ;;  %v1120_v6 = vmul.f32 %v1115_v63, %v1110_v37  ;;  %v1121_v12 = vmul.f32 %v1119_v4, %v1110_v37 }
 0x148   : > { %v1136_v3 = vmul.f32 %v1131_v20, %v1126_v62  ;;  %v1137_v17 = vmul.f32 %v1135_v18, %v1126_v62  ;;  %v1152_v41 = vmul.f32 %v1147_v7, %v1142_v16  ;;  %v1153_v40 = vmul.f32 %v1151_v36, %v1142_v16  ;;  %v1165_v7 = vld [vmem:[%s3365_s5] sm:$0xf] }
 0x149   : > { %v1106_v0 = vadd.f32 %v1104_v26, %v1061_v2  ;;  %v1107_v60 = vadd.f32 %v1105_v38, %v1062_v58  ;;  %v3399_v58 = vmov 35  }
 0x14b   : > { %v1122_v45 = vadd.f32 %v1120_v6, %v1106_v0  ;;  %v1123_v15 = vadd.f32 %v1121_v12, %v1107_v60  ;;  %v1159_v8 = vpop.permute.xlu1 %1158 }
 0x14d   : > { %v1138_v54 = vadd.f32 %v1136_v3, %v1122_v45  ;;  %v1139_v19 = vadd.f32 %v1137_v17, %v1123_v15 }
 0x14f   : > { %v1154_v10 = vadd.f32 %v1152_v41, %v1138_v54  ;;  %v1155_v51 = vadd.f32 %v1153_v40, %v1139_v19 }
 0x151   : > { %v1161_v28 = vadd.f32 %v1159_v8, %v1154_v10  ;;  %v1162_v35 = vadd.f32 %v1159_v8, %v1155_v51 }
 0x153   : > { %v3005_v39 = vmax.f32 %v1161_v28, 0.0  ;;  %v3007_v37 = vmax.f32 %v1162_v35, 0.0 }
 0x155   : > { %1168 = vrot.lane.b32.xlu1 %v3007_v37, %s2265_s12  ;;  %1166 = vrot.lane.b32.xlu0 %v3005_v39, %s2265_s12 }
 0x159   : > { %1544 = vperm.xlu1 %2140, %v2561_v32   ;;  %1239 = vrot.lane.b32.xlu0 %v3005_v39, %s2269_s29 }
 0x15d   : > { %1241 = vrot.lane.b32.xlu1 %v3007_v37, %s2269_s29  ;;  %1528 = vperm.xlu0 %2139, %v2561_v32  }
 0x15e   : > { %2141 = vset.pattern.permute.xlu1 %v2297_v31 }
 0x161   : > { %1311 = vrot.lane.b32.xlu1 %v3005_v39, %s2277_s17  ;;  %1521 = vrot.lane.b32.xlu0 %v3007_v37, %s2285_s15 }
 0x162   : > { %2142 = vset.pattern.permute.xlu0 %v2286_v21  ;;  %v1193_v21 = vpop.permute.xlu1 %1192 }
 0x165   : > { %1313 = vrot.lane.b32.xlu1 %v3007_v37, %s2277_s17  ;;  %1576 = vperm.xlu0 %2142, %v2561_v32   ;;  %s1887_s17 = scalar_lea.sflag [#allocation4], %s2455_s8 }
 0x169   : > { %1383 = vrot.lane.b32.xlu1 %v3005_v39, %s2283_s18  ;;  %1591 = vrot.lane.b32.xlu0 %v3005_v39, %s2287_s19 }
 0x16a   : > { %2145 = vset.pattern.permute.xlu0 %v2288_v22  ;;  %v3395_v22 = vmov 27  }
 0x16d   : > { %1385 = vrot.lane.b32.xlu1 %v3007_v37, %s2283_s18  ;;  %1632 = vperm.xlu0 %2145, %v2561_v32  }
 0x171   : > { %1519 = vrot.lane.b32.xlu1 %v3005_v39, %s2285_s15  ;;  %2148 = vset.pattern.permute.xlu0 %v2291_v25  ;;  %v1209_v25 = vpop.permute.xlu1 %1208 }
 0x172   : > { %1688 = vperm.xlu0 %2148, %v2561_v32  }
 0x175   : > { %1560 = vperm.xlu1 %2141, %v2561_v32  }
 0x176   : > { %2149 = vset.pattern.permute.xlu0 %v2293_v27  ;;  %v3396_v27 = vmov 28  }
 0x177   : > { %1704 = vperm.xlu0 %2149, %v2561_v32  }
 0x179   : > { %2143 = vset.pattern.permute.xlu1 %v2298_v33  ;;  %v2162_v33 = vld [vmem:[%s3364_s4] sm:$0xf] }
 0x17a   : > { %1600 = vperm.xlu1 %2143, %v2561_v32  }
 0x17b   : > { %2152 = vset.pattern.permute.xlu0 %v2295_v29  ;;  %v3058_v29 = vpop.permute.xlu1 %1248 }
 0x17c   : > { %1760 = vperm.xlu0 %2152, %v2561_v32  }
 0x17e   : > { %2144 = vset.pattern.permute.xlu1 %v2299_v34  ;;  %v1177_v34 = vpop.permute.xlu0 %1176 }
 0x17f   : > { %1616 = vperm.xlu1 %2144, %v2561_v32   ;;  %v3063_v31 = vpop.permute.xlu1 %1264 }
 0x180   : > { %2153 = vset.pattern.permute.xlu0 %v2296_v30  ;;  %v3397_v30 = vmov 31  }
 0x181   : > { %1776 = vperm.xlu0 %2153, %v2561_v32  }
 0x182   : > { %v1225_v4 = vpop.permute.xlu0 %1224 }
 0x183   : > { %1593 = vrot.lane.b32.xlu1 %v3007_v37, %s2287_s19  ;;  %v3070_v63 = vpop.permute.xlu1 %1296 }
 0x184   : > { %2146 = vset.pattern.permute.xlu1 %v3395_v22 }
 0x185   : > { %2156 = vset.pattern.permute.xlu0 %v2264_v1 }
 0x186   : > { %v3078_v26 = vpop.permute.xlu0 %1280 }
 0x187   : > { %1648 = vperm.xlu1 %2146, %v2561_v32   ;;  %v3073_v2 = vpop.permute.xlu1 %1320 }
 0x18a   : > { %v3084_v20 = vpop.permute.xlu0 %1336 }
 0x18b   : > { %2147 = vset.pattern.permute.xlu1 %v3396_v27  ;;  %v3080_v38 = vpop.permute.xlu1 %1368 }
 0x18c   : > { %1672 = vperm.xlu1 %2147, %v2561_v32   ;;  %v3398_v32 = vmov 32  }
 0x18e   : > { %v3092_v36 = vpop.permute.xlu0 %1352 }
 0x18f   : > { %v3086_v18 = vpop.permute.xlu1 %1392 }
 0x190   : > { %1663 = vrot.lane.b32.xlu1 %v3005_v39, %s2302_s22 }
 0x191   : > { %2150 = vset.pattern.permute.xlu1 %v3397_v30 }
 0x192   : > { %v3096_v12 = vpop.permute.xlu0 %1408 }
 0x193   : > { %v3094_v6 = vpop.permute.xlu1 %1440 }
 0x194   : > { %1665 = vrot.lane.b32.xlu1 %v3007_v37, %s2302_s22  ;;  %s2308_s22 = smov 125  }
 0x196   : > { %v3100_v60 = vpop.permute.xlu0 %1424 }
 0x197   : > { %v3098_v0 = vpop.permute.xlu1 %1456 }
 0x198   : > { %1720 = vperm.xlu1 %2150, %v2162_v33  }
 0x19a   : > { %v3104_v16 = vpop.permute.xlu0 %1472 }
 0x19b   : > { %v3102_v62 = vpop.permute.xlu1 %1488 }
 0x19c   : > { %2151 = vset.pattern.permute.xlu1 %v3398_v32 }
 0x19d   : > { %1744 = vperm.xlu1 %2151, %v2162_v33  }
 0x19f   : > { %v3106_v45 = vpop.permute.xlu1 %1504 }
 0x1a1   : > { %1735 = vrot.lane.b32.xlu1 %v3005_v39, %s2305_s21 }
 0x1a2   : > { %2154 = vset.pattern.permute.xlu1 %v3399_v58 }
 0x1a5   : > { %1737 = vrot.lane.b32.xlu1 %v3007_v37, %s2305_s21  ;;  %s294_s21 = scalar_lea.vmem [#allocation5], %s1978_s11 }
 0x1a6   : > { %s1901_s9 = sshll.u32 %s294_s21, 4  ;;  %s3318_s9 = int_to_ptr.vmem [resolvable:$true] %s1901_s9 }
 0x1a7   : > { %s2194_s18 = scalar_lea.vmem %s3318_s9, 128 }
 0x1a8   : > { %p2195_p6 = scmp.ne.s32.totalorder %s3318_s9, %s2194_s18 }
 0x1a9   : > { %1792 = vperm.xlu1 %2154, %v2162_v33  }
 0x1aa   : > { %p2196_p12 = pnand %p2195_p6, %p3411_p11 }
 0x1ac   : > { %p2197_p13 = pneg %p2196_p12 }
 0x1ad   : > { %2155 = vset.pattern.permute.xlu1 %v2264_v1 }
 0x1ae   : > { %1809 = vperm.xlu1 %2155, %v1165_v7  }
 0x1c7   : > { %v1169_v15 = vpop.permute.xlu1 %1168  ;;  %v1167_v3 = vpop.permute.xlu0 %1166 }
 0x1c8   : > { %v1170_v1 = vsel %vm309_vm3, %v1167_v3, %v1169_v15  ;;  %v1171_v17 = vsel %vm309_vm3, %v1169_v15, %v1167_v3  ;;  %vm3400_vm3 = vcmp.lt.s32.totalorder %v2637_v55, 1 }
 0x1c9   : > { %v1172_v41 = vsel %vm335_vm5, %v1171_v17, 0.0  ;;  %v1173_v40 = vsel %vm336_vm6, %v1170_v1, 0.0  ;;  %vm3401_vm5 = vmmov %vm3400_vm3  ;;  %vm3402_vm6 = vcmp.eq.s32.totalorder %v2792_v13, 1 }
 0x1ca   : > { %v1182_v54 = vrot.slane %v1172_v41, %v2624_v46  ;;  %v1186_v19 = vrot.slane %v1173_v40, %v2624_v46  ;;  %v1198_v8 = vrot.slane %v1172_v41, %v2672_v11  ;;  %v1202_v10 = vrot.slane %v1173_v40, %v2672_v11 }
 0x1cb   : > { %v1214_v51 = vrot.slane %v1172_v41, %v2629_v48  ;;  %v1218_v28 = vrot.slane %v1173_v40, %v2629_v48  ;;  %v1230_v3 = vrot.slane %v1172_v41, %v2711_v52  ;;  %v1234_v1 = vrot.slane %v1173_v40, %v2711_v52  ;;  %v1240_v17 = vpop.permute.xlu0 %1239 }
 0x1cc   : > { %v1187_v35 = vmul.f32 %v1182_v54, %v1177_v34  ;;  %v1188_v22 = vmul.f32 %v1186_v19, %v1177_v34  ;;  %v1203_v27 = vmul.f32 %v1198_v8, %v1193_v21  ;;  %v1204_v56 = vmul.f32 %v1202_v10, %v1193_v21 }
 0x1cd   : > { %v1219_v57 = vmul.f32 %v1214_v51, %v1209_v25  ;;  %v1220_v32 = vmul.f32 %v1218_v28, %v1209_v25  ;;  %v1235_v34 = vmul.f32 %v1230_v3, %v1225_v4  ;;  %v1236_v19 = vmul.f32 %v1234_v1, %v1225_v4 }
 0x1ce   : > { %v1205_v30 = vadd.f32 %v1203_v27, %v1187_v35  ;;  %v1206_v33 = vadd.f32 %v1204_v56, %v1188_v22 }
 0x1d0   : > { %v1221_v58 = vadd.f32 %v1219_v57, %v1205_v30  ;;  %v1222_v7 = vadd.f32 %v1220_v32, %v1206_v33 }
 0x1d2   : > { %v1237_v4 = vadd.f32 %v1235_v34, %v1221_v58  ;;  %v1238_v22 = vadd.f32 %v1236_v19, %v1222_v7 }
 0x1d8   : > { %v3122_v15 = vpop.permute.xlu1 %1544 }
 0x1dc   : > { %v1242_v5 = vpop.permute.xlu1 %1241 }
 0x1dd   : > { %v1243_v54 = vsel %vm408_vm8, %v1240_v17, %v1242_v5  ;;  %v1244_v21 = vsel %vm408_vm8, %v1242_v5, %v1240_v17  ;;  %vm3403_vm8 = vcmp.eq.s32.totalorder %v2795_v43, 1 }
 0x1de   : > { %v1245_v25 = vsel %vm427_vm9, %v1244_v21, 0.0  ;;  %v1246_v8 = vsel %vm428_vm10, %v1243_v54, 0.0  ;;  %vm3404_vm9 = vcmp.eq.s32.totalorder %v2871_v59, 1  ;;  %vm3405_vm10 = vcmp.eq.s32.totalorder %v2874_v23, 1 }
 0x1df   : > { %v1254_v41 = vrot.slane %v1245_v25, %v2624_v46  ;;  %v1258_v40 = vrot.slane %v1246_v8, %v2624_v46  ;;  %v1270_v10 = vrot.slane %v1245_v25, %v2672_v11  ;;  %v1274_v51 = vrot.slane %v1246_v8, %v2672_v11 }
 0x1e0   : > { %v1286_v28 = vrot.slane %v1245_v25, %v2629_v48  ;;  %v1290_v5 = vrot.slane %v1246_v8, %v2629_v48  ;;  %v1312_v35 = vpop.permute.xlu1 %1311  ;;  %v1302_v27 = vrot.slane %v1245_v25, %v2711_v52  ;;  %v1306_v56 = vrot.slane %v1246_v8, %v2711_v52 }
 0x1e1   : > { %v1259_v47 = vmul.f32 %v1254_v41, %v3058_v29  ;;  %v1260_v49 = vmul.f32 %v1258_v40, %v3058_v29  ;;  %v1275_v57 = vmul.f32 %v1270_v10, %v3063_v31  ;;  %v1276_v32 = vmul.f32 %v1274_v51, %v3063_v31 }
 0x1e2   : > { %v1291_v3 = vmul.f32 %v1286_v28, %v3078_v26  ;;  %v1292_v1 = vmul.f32 %v1290_v5, %v3078_v26  ;;  %v1307_v21 = vmul.f32 %v1302_v27, %v3070_v63  ;;  %v1308_v34 = vmul.f32 %v1306_v56, %v3070_v63 }
 0x1e3   : > { %v1261_v30 = vadd.f32 %v1259_v47, %v1237_v4  ;;  %v1262_v33 = vadd.f32 %v1260_v49, %v1238_v22  ;;  %v1510_v59 = vrot.slane %v3005_v39, %v2711_v52  ;;  %v1514_v23 = vrot.slane %v3007_v37, %v2711_v52 }
 0x1e4   : > { %v1314_v58 = vpop.permute.xlu1 %1313 }
 0x1e5   : > { %v1277_v7 = vadd.f32 %v1275_v57, %v1261_v30  ;;  %v1278_v17 = vadd.f32 %v1276_v32, %v1262_v33  ;;  %v1315_v29 = vsel %vm499_vm12, %v1312_v35, %v1314_v58  ;;  %v1316_v54 = vsel %vm499_vm12, %v1314_v58, %v1312_v35 }
 0x1e6   : > { %v1317_v31 = vsel %vm525_vm13, %v1316_v54, 0.0  ;;  %v1318_v19 = vsel %vm526_vm14, %v1315_v29, 0.0  ;;  %vm3406_vm12 = vcmp.lt.s32.totalorder %v2637_v55, 113  ;;  %vm3408_vm14 = vcmp.eq.s32.totalorder %v2912_v9, 1 }
 0x1e7   : > { %v1293_v26 = vadd.f32 %v1291_v3, %v1277_v7  ;;  %v1294_v25 = vadd.f32 %v1292_v1, %v1278_v17  ;;  %v1326_v8 = vrot.slane %v1317_v31, %v2624_v46  ;;  %v1330_v41 = vrot.slane %v1318_v19, %v2624_v46  ;;  %vm3407_vm13 = vmmov %vm3406_vm12 }
 0x1e8   : > { %v1342_v40 = vrot.slane %v1317_v31, %v2672_v11  ;;  %v1346_v10 = vrot.slane %v1318_v19, %v2672_v11  ;;  %v1358_v51 = vrot.slane %v1317_v31, %v2629_v48  ;;  %v1362_v63 = vrot.slane %v1318_v19, %v2629_v48  ;;  %v1384_v28 = vpop.permute.xlu1 %1383 }
 0x1e9   : > { %v1309_v14 = vadd.f32 %v1307_v21, %v1293_v26  ;;  %v1310_v5 = vadd.f32 %v1308_v34, %v1294_v25  ;;  %v1331_v50 = vmul.f32 %v1326_v8, %v3073_v2  ;;  %v1332_v35 = vmul.f32 %v1330_v41, %v3073_v2  ;;  %v3182_v21 = vpop.permute.xlu0 %1528 }
 0x1ea   : > { %v1347_v4 = vmul.f32 %v1342_v40, %v3084_v20  ;;  %v1348_v22 = vmul.f32 %v1346_v10, %v3084_v20  ;;  %v1374_v27 = vrot.slane %v1317_v31, %v2711_v52  ;;  %v1378_v56 = vrot.slane %v1318_v19, %v2711_v52 }
 0x1eb   : > { %v1333_v47 = vadd.f32 %v1331_v50, %v1309_v14  ;;  %v1334_v49 = vadd.f32 %v1332_v35, %v1310_v5  ;;  %v1363_v32 = vmul.f32 %v1358_v51, %v3092_v36  ;;  %v1364_v3 = vmul.f32 %v1362_v63, %v3092_v36 }
 0x1ec   : > { %v1386_v30 = vpop.permute.xlu1 %1385  ;;  %v1379_v1 = vmul.f32 %v1374_v27, %v3080_v38  ;;  %v1380_v2 = vmul.f32 %v1378_v56, %v3080_v38  ;;  %v1478_v50 = vrot.slane %v3005_v39, %v2672_v11  ;;  %v1466_v27 = vrot.slane %v3007_v37, %v2624_v46 }
 0x1ed   : > { %v1349_v33 = vadd.f32 %v1347_v4, %v1333_v47  ;;  %v1350_v57 = vadd.f32 %v1348_v22, %v1334_v49  ;;  %v1387_v20 = vsel %vm3400_vm3, %v1384_v28, %v1386_v30  ;;  %v1388_v58 = vsel %vm3401_vm5, %v1386_v30, %v1384_v28  ;;  %v1522_v35 = vpop.permute.xlu0 %1521 }
 0x1ee   : > { %v1389_v29 = vsel %vm3402_vm6, %v1388_v58, 0.0  ;;  %v1390_v54 = vsel %vm3403_vm8, %v1387_v20, 0.0  ;;  %v1462_v49 = vrot.slane %v3005_v39, %v2624_v46 }
 0x1ef   : > { %v1365_v7 = vadd.f32 %v1363_v32, %v1349_v33  ;;  %v1366_v17 = vadd.f32 %v1364_v3, %v1350_v57  ;;  %v1398_v36 = vrot.slane %v1389_v29, %v2624_v46  ;;  %v1402_v38 = vrot.slane %v1390_v54, %v2624_v46 }
 0x1f0   : > { %v1414_v34 = vrot.slane %v1389_v29, %v2672_v11  ;;  %v1418_v31 = vrot.slane %v1390_v54, %v2672_v11  ;;  %v1520_v19 = vpop.permute.xlu1 %1519  ;;  %v1430_v43 = vrot.slane %v1389_v29, %v2629_v48  ;;  %v1434_v41 = vrot.slane %v1390_v54, %v2629_v48 }
 0x1f1   : > { %v1381_v26 = vadd.f32 %v1379_v1, %v1365_v7  ;;  %v1382_v25 = vadd.f32 %v1380_v2, %v1366_v17  ;;  %v1403_v8 = vmul.f32 %v1398_v36, %v3086_v18  ;;  %v1404_v13 = vmul.f32 %v1402_v38, %v3086_v18 }
 0x1f2   : > { %v1419_v40 = vmul.f32 %v1414_v34, %v3096_v12  ;;  %v1420_v10 = vmul.f32 %v1418_v31, %v3096_v12  ;;  %v1446_v28 = vrot.slane %v1389_v29, %v2711_v52  ;;  %v1450_v14 = vrot.slane %v1390_v54, %v2711_v52 }
 0x1f3   : > { %v1405_v51 = vadd.f32 %v1403_v8, %v1381_v26  ;;  %v1406_v63 = vadd.f32 %v1404_v13, %v1382_v25  ;;  %v1482_v18 = vrot.slane %v3007_v37, %v2672_v11  ;;  %v1435_v47 = vmul.f32 %v1430_v43, %v3100_v60 }
 0x1f4   : > { %v3196_v5 = vpop.permute.xlu1 %1560  ;;  %v1436_v12 = vmul.f32 %v1434_v41, %v3100_v60  ;;  %v1523_v56 = vsel %vm792_vm11, %v1520_v19, %v1522_v35  ;;  %v1524_v30 = vsel %vm792_vm11, %v1522_v35, %v1520_v19  ;;  %v1451_v32 = vmul.f32 %v1446_v28, %v3094_v6 }
 0x1f5   : > { %v1421_v4 = vadd.f32 %v1419_v40, %v1405_v51  ;;  %v1422_v22 = vadd.f32 %v1420_v10, %v1406_v63  ;;  %v1452_v3 = vmul.f32 %v1450_v14, %v3094_v6  ;;  %v1467_v60 = vmul.f32 %v1462_v49, %v3098_v0 }
 0x1f6   : > { %v1468_v1 = vmul.f32 %v1466_v27, %v3098_v0  ;;  %v1525_v7 = vsel %vm3404_vm9, %v1523_v56, 0.0  ;;  %v1526_v17 = vsel %vm3405_vm10, %v1524_v30, 0.0  ;;  %v1494_v29 = vrot.slane %v3005_v39, %v2629_v48  ;;  %v1577_v0 = vpop.permute.xlu0 %1576 }
 0x1f7   : > { %v1437_v33 = vadd.f32 %v1435_v47, %v1421_v4  ;;  %v1438_v57 = vadd.f32 %v1436_v12, %v1422_v22  ;;  %v1498_v54 = vrot.slane %v3007_v37, %v2629_v48  ;;  %v1483_v6 = vmul.f32 %v1478_v50, %v3104_v16 }
 0x1f8   : > { %v1484_v36 = vmul.f32 %v1482_v18, %v3104_v16  ;;  %v1534_v31 = vrot.slane %v1525_v7, %v2624_v46  ;;  %v1538_v19 = vrot.slane %v1526_v17, %v2624_v46  ;;  %v1499_v26 = vmul.f32 %v1494_v29, %v3102_v62 }
 0x1f9   : > { %v1601_v2 = vpop.permute.xlu1 %1600  ;;  %v1453_v20 = vadd.f32 %v1451_v32, %v1437_v33  ;;  %v1454_v58 = vadd.f32 %v1452_v3, %v1438_v57  ;;  %v1500_v25 = vmul.f32 %v1498_v54, %v3102_v62  ;;  %v1515_v43 = vmul.f32 %v1510_v59, %v3106_v45 }
 0x1fa   : > { %v1516_v41 = vmul.f32 %v1514_v23, %v3106_v45  ;;  %v1550_v39 = vrot.slane %v1525_v7, %v2672_v11  ;;  %v1554_v40 = vrot.slane %v1526_v17, %v2672_v11  ;;  %v1539_v51 = vmul.f32 %v1534_v31, %v3182_v21  ;;  %v1592_v28 = vpop.permute.xlu0 %1591 }
 0x1fb   : > { %v1469_v38 = vadd.f32 %v1467_v60, %v1453_v20  ;;  %v1470_v34 = vadd.f32 %v1468_v1, %v1454_v58  ;;  %v1540_v63 = vmul.f32 %v1538_v19, %v3182_v21  ;;  %v1566_v50 = vrot.slane %v1525_v7, %v2629_v48 }
 0x1fc   : > { %v1570_v18 = vrot.slane %v1526_v17, %v2629_v48  ;;  %v1582_v45 = vrot.slane %v1525_v7, %v2711_v52  ;;  %v1586_v4 = vrot.slane %v1526_v17, %v2711_v52  ;;  %v1555_v49 = vmul.f32 %v1550_v39, %v3122_v15 }
 0x1fd   : > { %v1485_v8 = vadd.f32 %v1483_v6, %v1469_v38  ;;  %v1486_v13 = vadd.f32 %v1484_v36, %v1470_v34  ;;  %v1556_v27 = vmul.f32 %v1554_v40, %v3122_v15  ;;  %vm3409_vm11 = vcmp.eq.s32.totalorder %v2915_v24, 1 }
 0x1fe   : > { %v1617_v16 = vpop.permute.xlu1 %1616  ;;  %v1571_v32 = vmul.f32 %v1566_v50, %v3196_v5  ;;  %v1572_v3 = vmul.f32 %v1570_v18, %v3196_v5  ;;  %v1587_v1 = vmul.f32 %v1582_v45, %v1577_v0  ;;  %v1588_v20 = vmul.f32 %v1586_v4, %v1577_v0 }
 0x1ff   : > { %v1501_v37 = vadd.f32 %v1499_v26, %v1485_v8  ;;  %v1502_v10 = vadd.f32 %v1500_v25, %v1486_v13  ;;  %v1633_v26 = vpop.permute.xlu0 %1632 }
 0x201   : > { %v1517_v14 = vadd.f32 %v1515_v43, %v1501_v37  ;;  %v1518_v62 = vadd.f32 %v1516_v41, %v1502_v10 }
 0x202   : > { %v1594_v35 = vpop.permute.xlu1 %1593 }
 0x203   : > { %v1595_v22 = vsel %vm3406_vm12, %v1592_v28, %v1594_v35  ;;  %v1596_v47 = vsel %vm3407_vm13, %v1594_v35, %v1592_v28  ;;  %v1541_v12 = vadd.f32 %v1539_v51, %v1517_v14  ;;  %v1542_v21 = vadd.f32 %v1540_v63, %v1518_v62  ;;  %v1689_v4 = vpop.permute.xlu0 %1688 }
 0x204   : > { %v1597_v56 = vsel %vm3408_vm14, %v1595_v22, 0.0  ;;  %v1598_v30 = vsel %vm3409_vm11, %v1596_v47, 0.0 }
 0x205   : > { %v1557_v33 = vadd.f32 %v1555_v49, %v1541_v12  ;;  %v1558_v57 = vadd.f32 %v1556_v27, %v1542_v21  ;;  %v1606_v17 = vrot.slane %v1597_v56, %v2624_v46  ;;  %v1610_v15 = vrot.slane %v1598_v30, %v2624_v46 }
 0x206   : > { %v1649_v60 = vpop.permute.xlu1 %1648  ;;  %v1622_v36 = vrot.slane %v1597_v56, %v2672_v11  ;;  %v1626_v38 = vrot.slane %v1598_v30, %v2672_v11  ;;  %v1638_v31 = vrot.slane %v1597_v56, %v2629_v48  ;;  %v1642_v19 = vrot.slane %v1598_v30, %v2629_v48 }
 0x207   : > { %v1573_v58 = vadd.f32 %v1571_v32, %v1557_v33  ;;  %v1574_v7 = vadd.f32 %v1572_v3, %v1558_v57  ;;  %v1611_v24 = vmul.f32 %v1606_v17, %v1601_v2  ;;  %v1612_v6 = vmul.f32 %v1610_v15, %v1601_v2  ;;  %v1705_v57 = vpop.permute.xlu0 %1704 }
 0x208   : > { %v1627_v23 = vmul.f32 %v1622_v36, %v1617_v16  ;;  %v1628_v0 = vmul.f32 %v1626_v38, %v1617_v16  ;;  %v1654_v13 = vrot.slane %v1597_v56, %v2711_v52  ;;  %v1658_v2 = vrot.slane %v1598_v30, %v2711_v52 }
 0x209   : > { %v1589_v9 = vadd.f32 %v1587_v1, %v1573_v58  ;;  %v1590_v29 = vadd.f32 %v1588_v20, %v1574_v7  ;;  %v1643_v41 = vmul.f32 %v1638_v31, %v1633_v26  ;;  %v1644_v39 = vmul.f32 %v1642_v19, %v1633_v26 }
 0x20a   : > { %v1659_v50 = vmul.f32 %v1654_v13, %v1649_v60  ;;  %v1660_v18 = vmul.f32 %v1658_v2, %v1649_v60 }
 0x20b   : > { %v1673_v54 = vpop.permute.xlu1 %1672  ;;  %v1614_v34 = vadd.f32 %v1612_v6, %v1590_v29  ;;  %v1613_v5 = vadd.f32 %v1611_v24, %v1589_v9  ;;  %v1761_v29 = vpop.permute.xlu0 %1760 }
 0x20d   : > { %v1630_v25 = vadd.f32 %v1628_v0, %v1614_v34  ;;  %v1629_v8 = vadd.f32 %v1627_v23, %v1613_v5 }
 0x20f   : > { %v1664_v59 = vpop.permute.xlu1 %1663  ;;  %v1645_v51 = vadd.f32 %v1643_v41, %v1629_v8  ;;  %v1646_v63 = vadd.f32 %v1644_v39, %v1630_v25  ;;  %v1777_v13 = vpop.permute.xlu0 %1776 }
 0x211   : > { %v1661_v22 = vadd.f32 %v1659_v50, %v1645_v51  ;;  %v1662_v47 = vadd.f32 %v1660_v18, %v1646_v63 }
 0x213   : > { %v1666_v43 = vpop.permute.xlu1 %1665 }
 0x214   : > { %v1667_v40 = vsel %vm976_vm0, %v1664_v59, %v1666_v43  ;;  %v1668_v16 = vsel %vm976_vm0, %v1666_v43, %v1664_v59  ;;  %vm1818_vm0 = vcmask 1043456  }
 0x215   : > { %v1669_v37 = vsel %vm995_vm15, %v1667_v40, 0.0  ;;  %v1670_v10 = vsel %vm996_vm1, %v1668_v16, 0.0 }
 0x216   : > { %v1678_v28 = vrot.slane %v1669_v37, %v2624_v46  ;;  %v1682_v14 = vrot.slane %v1670_v10, %v2624_v46  ;;  %v1694_v42 = vrot.slane %v1669_v37, %v2672_v11  ;;  %v1698_v12 = vrot.slane %v1670_v10, %v2672_v11 }
 0x217   : > { %v1721_v62 = vpop.permute.xlu1 %1720  ;;  %v1710_v30 = vrot.slane %v1669_v37, %v2629_v48  ;;  %v1714_v33 = vrot.slane %v1670_v10, %v2629_v48  ;;  %v1726_v1 = vrot.slane %v1669_v37, %v2711_v52  ;;  %v1730_v20 = vrot.slane %v1670_v10, %v2711_v52 }
 0x218   : > { %v1683_v35 = vmul.f32 %v1678_v28, %v1673_v54  ;;  %v1684_v45 = vmul.f32 %v1682_v14, %v1673_v54  ;;  %v1699_v27 = vmul.f32 %v1694_v42, %v1689_v4  ;;  %v1700_v56 = vmul.f32 %v1698_v12, %v1689_v4  ;;  %v3410_v42 = vld [vmem:[#allocation8_spill] sm:$0xff] }
 0x219   : > { %v1715_v58 = vmul.f32 %v1710_v30, %v1705_v57  ;;  %v1716_v7 = vmul.f32 %v1714_v33, %v1705_v57  ;;  %v1731_v6 = vmul.f32 %v1726_v1, %v1721_v62  ;;  %v1732_v36 = vmul.f32 %v1730_v20, %v1721_v62  ;;  %v1830_v57 = vld [vmem:[%s3366_s6] sm:$0xf] }
 0x21a   : > { %v1686_v53 = vadd.f32 %v1684_v45, %v1662_v47  ;;  %v1685_v21 = vadd.f32 %v1683_v35, %v1661_v22  ;;  %v2163_v22 = vld [vmem:[%s2461_s23] sm:$0xff]  ;;  %s2307_s23 = smov 126  }
 0x21c   : > { %v1745_v49 = vpop.permute.xlu1 %1744  ;;  %v1701_v32 = vadd.f32 %v1699_v27, %v1685_v21  ;;  %v1702_v3 = vadd.f32 %v1700_v56, %v1686_v53 }
 0x21e   : > { %v1717_v17 = vadd.f32 %v1715_v58, %v1701_v32  ;;  %v1718_v15 = vadd.f32 %v1716_v7, %v1702_v3 }
 0x220   : > { %v1736_v60 = vpop.permute.xlu1 %1735  ;;  %v1733_v31 = vadd.f32 %v1731_v6, %v1717_v17  ;;  %v1734_v19 = vadd.f32 %v1732_v36, %v1718_v15 }
 0x224   : > { %v1738_v9 = vpop.permute.xlu1 %1737 }
 0x225   : > { %v1739_v54 = vsel %vm1067_vm4, %v1736_v60, %v1738_v9  ;;  %v1740_v24 = vsel %vm1067_vm4, %v1738_v9, %v1736_v60 }
 0x226   : > { %v1741_v38 = vsel %vm1088_vm7, %v1739_v54, 0.0  ;;  %v1742_v34 = vsel %vm1089_vm2, %v1740_v24, 0.0 }
 0x227   : > { %v1750_v5 = vrot.slane %v1741_v38, %v2624_v46  ;;  %v1754_v59 = vrot.slane %v1742_v34, %v2624_v46  ;;  %v1766_v23 = vrot.slane %v1741_v38, %v2672_v11  ;;  %v1770_v0 = vrot.slane %v1742_v34, %v2672_v11 }
 0x228   : > { %v1782_v25 = vrot.slane %v1741_v38, %v2629_v48  ;;  %v1786_v44 = vrot.slane %v1742_v34, %v2629_v48  ;;  %v1798_v8 = vrot.slane %v1741_v38, %v2711_v52  ;;  %v1802_v61 = vrot.slane %v1742_v34, %v2711_v52  ;;  %v1793_v40 = vpop.permute.xlu1 %1792 }
 0x229   : > { %v1755_v55 = vmul.f32 %v1750_v5, %v1745_v49  ;;  %v1756_v26 = vmul.f32 %v1754_v59, %v1745_v49  ;;  %v1771_v41 = vmul.f32 %v1766_v23, %v1761_v29  ;;  %v1772_v39 = vmul.f32 %v1770_v0, %v1761_v29 }
 0x22a   : > { %v1787_v10 = vmul.f32 %v1782_v25, %v1777_v13  ;;  %v1788_v51 = vmul.f32 %v1786_v44, %v1777_v13  ;;  %v1803_v63 = vmul.f32 %v1798_v8, %v1793_v40  ;;  %v1804_v28 = vmul.f32 %v1802_v61, %v1793_v40 }
 0x22b   : > { %v1758_v2 = vadd.f32 %v1756_v26, %v1734_v19  ;;  %v1757_v43 = vadd.f32 %v1755_v55, %v1733_v31 }
 0x22d   : > { %v1773_v16 = vadd.f32 %v1771_v41, %v1757_v43  ;;  %v1774_v37 = vadd.f32 %v1772_v39, %v1758_v2  ;;  %v1810_v50 = vpop.permute.xlu1 %1809 }
 0x22f   : > { %v1789_v14 = vadd.f32 %v1787_v10, %v1773_v16  ;;  %v1790_v62 = vadd.f32 %v1788_v51, %v1774_v37 }
 0x231   : > { %v1805_v18 = vadd.f32 %v1803_v63, %v1789_v14  ;;  %v1806_v35 = vadd.f32 %v1804_v28, %v1790_v62 }
 0x233   : > { %v1812_v45 = vadd.f32 %v1810_v50, %v1805_v18  ;;  %v1813_v4 = vadd.f32 %v1810_v50, %v1806_v35 }
 0x235   : > { %v1814_v47 = vadd.f32 %v2163_v22, %v1812_v45  ;;  %v1815_v12 = vadd.f32 %v1813_v4, %v3410_v42 }
 0x237   : > { %v1816_v53 = vmax.f32 %v1814_v47, 0.0  ;;  %v1817_v21 = vmax.f32 %v1815_v12, 0.0 }
 0x239   : > { %v1824_v49 = vsel %vm1818_vm0, %v1816_v53, 0.0  ;;  %v1825_v27 = vsel %vm1818_vm0, %v1817_v21, 0.0  ;;  %v1819_v15 = vsel %vm1818_vm0, %v1816_v53, -inf }
 0x23a   : > { %v1826_v56 = vadd.f32 %v1825_v27, %v1824_v49 }
 0x23c   : > { %1827 = vadd.xlane.f32.xlu0 %v1826_v56 }
 0x2c9   : > { %v1828_v30 = vpop.xlane.xlu0 %1827 }
 0x2ca   : > { %v1829_v33 = vmul.f32 0.00390625, %v1828_v30 }
 0x2cc   : > { %v1840_v32 = vrot.slane %v1829_v33, %v2672_v11  ;;  %v1834_v3 = vrot.slane %v1829_v33, %v2624_v46  ;;  %v1850_v60 = vrot.slane %v1829_v33, %v2629_v48  ;;  %v1860_v58 = vrot.slane %v1829_v33, %v2711_v52 }
 0x2cd   : > { %v1820_v11 = vsel %vm1818_vm0, %v1817_v21, -inf }
 0x2ce   : > { %v1841_v1 = vmul.f32 %v1840_v32, %v1830_v57  ;;  %v1835_v20 = vmul.f32 %v1834_v3, %v1830_v57  ;;  %v1851_v7 = vmul.f32 %v1850_v60, %v1830_v57  ;;  %v1861_v17 = vmul.f32 %v1860_v58, %v1830_v57 }
 0x2cf   : > { %v1821_v9 = vmax.f32 %v1819_v15, %v1820_v11 }
 0x2d0   : > { %1843 = vrot.lane.b32.xlu1 %v1841_v1, %s2285_s15  ;;  %s1989_s15 = sshll.u32 %s2371_s28, 7  ;;  %s2309_s28 = smov [#allocation5]  }
 0x2d1   : > { %s3316_s29 = scalar_lea.hbm %s3367_s7, %s1989_s15  ;;  %s2198_s11 = sshll.u32 %s2309_s28, 4  ;;  %s2199_s11 = int_to_ptr.vmem [resolvable:$false] %s2198_s11 }
 0x2d2   : > { %s2200_s19 = scalar_lea.vmem %s2199_s11, 256  ;;  %p2201_p7 = scmp.lt.s32.totalorder %s3318_s9, %s2199_s11 }
 0x2d3   : > { %p2202_p10 = scmp.lt.s32.totalorder %s2200_s19, %s2194_s18 }
 0x2d4   : > { %1853 = vrot.lane.b32.xlu1 %v1851_v7, %s2307_s23 }
 0x2d5   : > { %p2203_p2 = por %p2202_p10, %p2201_p7 }
 0x2d7   : > { %p2204_p4 = pnand %p2203_p2, %p2197_p13 }
 0x2d8   : > { %1863 = vrot.lane.b32.xlu1 %v1861_v17, %s2308_s22 }
 0x2fc   : > { %1822 = vmax.xlane.f32.xlu1 %v1821_v9 }
 0x342   : > { %v1844_v46 = vpop.permute.xlu1 %1843 }
 0x343   : > { %v1846_v29 = vadd.f32 %v1844_v46, %v1835_v20 }
 0x346   : > { %v1854_v48 = vpop.permute.xlu1 %1853 }
 0x347   : > { %v1856_v24 = vadd.f32 %v1854_v48, %v1846_v29 }
 0x34a   : > { %v1864_v54 = vpop.permute.xlu1 %1863 }
 0x34b   : > { %v1866_v52 = vadd.f32 %v1864_v54, %v1856_v24 }
 0x34d   : > { %v1982_v6 = vmul.f32 -1.442695, %v1866_v52 }
 0x34f   : > { %2158 = vpow2.f32 %v1982_v6 }
 0x359   : > { %v2159_v36 = vpop.eup %2158 }
 0x35a   : > { %v1870_v38 = vadd.f32 1.0, %v2159_v36 }
 0x35c   : > { %2160 = vrcp.f32 %v1870_v38 }
 0x366   : > { %v2161_v34 = vpop.eup %2160 }
 0x389   : > { %v1823_v5 = vpop.xlane.xlu1 %1822 }
 0x38a   : > { %v1873_v59 = vmul.f32 %v2161_v34, %v1823_v5 }
 0x38c   : > { %1876 = vperm.xlu0 %2156, %v1873_v59  }
 0x40b   : > { %v1877_v23 = vpop.permute.xlu0 %1876 }
 0x40c   : > { %v1879_v0 = vmin.f32 %v1816_v53, %v1877_v23  ;;  %v1880_v31 = vmin.f32 %v1817_v21, %v1877_v23 }
 0x40e   : > { %v1883_v19 = vcombine.low %v1879_v0, %v1880_v31 }
 0x410   : > { %1885 = vst [vmem:[%s294_s21] sm:$0xff] %v1883_v19 }
 0x411   : > { %2207 = shalt.err (!%p2204_p4)
}
 0x412   : > { %s2208_s8 = scalar_lea.hbm %s3316_s29, 128  ;;  %s2212_s22 = scalar_lea.hbm %s3367_s7, 256 }
 0x413   : > { %p2209_p5 = scmp.ne.s32.totalorder %s3316_s29, %s2208_s8  ;;  %p2213_p0 = scmp.lt.u32.totalorder %s3316_s29, %s3367_s7 }
 0x414   : > { %p2214_p1 = scmp.lt.u32.totalorder %s2212_s22, %s2208_s8  ;;  %p2216_p6 = scmp.lt.u32.totalorder %s2208_s8, %s3316_s29 }
 0x415   : > { %p2210_p8 = pnand %p2209_p5, %p3411_p11 }
 0x416   : > { %p2215_p3 = por %p2214_p1, %p2213_p0 }
 0x417   : > { %p2211_p9 = pneg %p2210_p8 }
 0x418   : > { %p2217_p12 = por %p2216_p6, %p2215_p3 }
 0x41a   : > { %p2218_p13 = pnand %p2217_p12, %p2211_p9 }
 0x41c   : > { %2221 = shalt.err (!%p2218_p13)
}
 0x41d   : > { %1992 = dma.vmem_to_hbm [thread:$0]  (%p3411_p11), %s3318_s9, 128, %s3316_s29, %s1887_s17  }
 0x41e PF: > { %s1913_s16 = sand.u32 1, %s2248_s24   ;;  %p3412_p7 = scmp.ne.s32.totalorder %s3386_s14, 0 }
 0x41f   : > { %p3413_p10 = scmp.ge.s32.totalorder %s2260_s27, 2  ;;  %s1914_s12 = scalar_lea.sflag [#allocation4], %s1913_s16 }
 0x421   : > { %p1999_p2 = pnand %p3413_p10, %p3412_p7 }
 0x423   : > { %2243 = dma.done.wait (!%p1999_p2), %s1914_s12, 128  }
 0x424   : > { %2245 = vsyncadd (!%p1999_p2), %s1914_s12, 4294967168  ;;  %p20_p4 = scmp.ge.s32.totalorder %s2375_s30, 4   ;;  %s3414_s24 = smov %s2252_s25 }
 0x425   : > { %s3415_s25 = smov %s2256_s26  ;;  %s3416_s26 = smov %s2387_s10 }
 0x426   : > { %s3417_s27 = smov %s2375_s30  ;;  %22 = sbr.rel (!%p20_p4) target bundleno = 5 (0x5), region = 93 }
 0x42d   :  { %1919 = vsyncpa [#allocation3], 1 }
 0x42e   :  { %1921 = vsyncpa [#allocation3 + $0x1], 1 }
 0x42f   :  { %1922 = vsyncpa [#allocation4], 1 }
 0x430   :  { %1924 = vsyncpa [#allocation4 + $0x1], 1 }

</bundles_post_ra>
